<compile_context>
chip_gen: v5e
topology: v5e:2x2
jax: 0.10.0
libtpu: 0.0.40
codegen_flags: <defaults>
</compile_context>

<pallas_src>
import math

import jax
import jax.numpy as jnp
import numpy as np
from jax import lax
from jax.experimental import pallas as pl
from jax.experimental.pallas import tpu as pltpu


def _dkvmn_kernel(k_ref, v_ref, mk_ref, mv0_ref, ew_ref, ee_ref,
                  we_ref, be_ref, wa_ref, ba_ref, wf_ref, bf_ref,
                  wp_ref, bp_ref,
                  p_ref, mv_ref,
                  read_scr):
    TB, L, D = k_ref.shape          # batch tile, seq, dim_s
    M = mk_ref.shape[0]             # size_m
    MD = M * D

    # leading-dim flattens are layout-only when L % 8 == 0
    k2 = k_ref[...].reshape(TB * L, D)
    v2 = v_ref[...].reshape(TB * L, D)

    # ---- correlation weights: softmax(k @ Mk^T) over memory slots ----------
    scores = lax.dot_general(k2, mk_ref[...], (((1,), (1,)), ((), ())),
                             preferred_element_type=jnp.float32)        # (TB*L, M)
    scores = scores - jnp.max(scores, axis=-1, keepdims=True)
    ex = jnp.exp(scores)
    w2 = ex * pl.reciprocal(jnp.sum(ex, axis=-1, keepdims=True), approx=True)

    # ---- erase / add gates (one batched matmul each over TB*L rows) --------
    e2 = jax.nn.sigmoid(jnp.dot(v2, we_ref[...],
                                preferred_element_type=jnp.float32) + be_ref[...])
    a2 = jnp.tanh(jnp.dot(v2, wa_ref[...],
                          preferred_element_type=jnp.float32) + ba_ref[...])

    w3 = w2.reshape(TB, L, M)
    e3 = e2.reshape(TB, L, D)
    a3 = a2.reshape(TB, L, D)

    ew = ew_ref[...]       # (M, M*D): ew[m, m*D + d] = 1
    ee = ee_ref[...]       # (D, M*D): ee[d, m*D + d] = 1

    # ---- sequential value-memory recurrence, lane-dense state (TB, M*D) ----
    state = jnp.broadcast_to(mv0_ref[...], (TB, MD))
    mv_ref[:, 0, :] = state

    # L is a compile-time constant; fully unroll so the scheduler sees across
    # steps.  TODO(synk): switch to a fori_loop over ref-resident w/e/a for very large L.
    for t in range(L):
        wt = w3[:, t, :]                                   # (TB, M)
        et = e3[:, t, :]                                   # (TB, D)
        at = a3[:, t, :]                                   # (TB, D)
        # expand to the flat (TB, M*D) layout via tiny 0/1 matmuls (MXU)
        w_big = jnp.dot(wt, ew, preferred_element_type=jnp.float32)
        e_big = jnp.dot(et, ee, preferred_element_type=jnp.float32)
        a_big = jnp.dot(at, ee, preferred_element_type=jnp.float32)
        # read vector uses the *pre-update* memory state
        read_t = lax.dot_general(w_big * state, ee, (((1,), (1,)), ((), ())),
                                 preferred_element_type=jnp.float32)    # (TB, D)
        read_scr[:, t, :] = read_t
        # Mv_{t+1} = Mv_t * (1 - w (x) e) + w (x) a
        state = state * (1.0 - w_big * e_big) + w_big * a_big
        mv_ref[:, t + 1, :] = state

    # ---- f = tanh([read, k] @ Wf + bf), p = sigmoid(<f, wp> + bp) -----------
    wf = wf_ref[...]                                       # (2D, D)
    read2 = read_scr[...].reshape(TB * L, D)
    f2 = jnp.tanh(
        jnp.dot(read2, wf[0:D, :], preferred_element_type=jnp.float32)
        + jnp.dot(k2, wf[D:2 * D, :], preferred_element_type=jnp.float32)
        + bf_ref[...])                                     # (TB*L, D)
    f3 = f2.reshape(TB, L, D)
    wp3 = wp_ref[...].reshape(1, 1, D)
    p_ref[...] = jax.nn.sigmoid(jnp.sum(f3 * wp3, axis=-1) + bp_ref[...])   # (TB, L)


def dkvmn_forward(q, r, pid, params):
    (k_table, pid_table, v_table, Mk, Mv0,
     We, be, Wa, ba, Wf, bf, Wp, bp) = params
    num_q = k_table.shape[0]
    B, L = q.shape
    M, D = Mk.shape
    MD = M * D

    # glue: embedding lookups (gathers) stay in plain JAX
    x = q + num_q * r
    pe = pid_table[pid]
    k = k_table[q] + pe          # (B, L, D)
    v = v_table[x] + pe          # (B, L, D)

    # batch tile: 8 rows per grid step when possible (amortizes the ~0.35us
    # per-step overhead and fills MXU/VPU rows); otherwise one tile = whole batch.
    TB = 8 if (B % 8 == 0) else B
    nb = B // TB

    # constant 0/1 expansion matrices (exact in any matmul precision)
    jj = np.arange(MD)
    E_w = jnp.asarray((jj[None, :] // D) == np.arange(M)[:, None], dtype=jnp.float32)  # (M, MD)
    E_e = jnp.asarray((jj[None, :] % D) == np.arange(D)[:, None], dtype=jnp.float32)   # (D, MD)

    grid_spec = pltpu.PrefetchScalarGridSpec(
        num_scalar_prefetch=0,
        grid=(nb,),
        in_specs=[
            pl.BlockSpec((TB, L, D), lambda b: (b, 0, 0)),       # k
            pl.BlockSpec((TB, L, D), lambda b: (b, 0, 0)),       # v
            pl.BlockSpec((M, D), lambda b: (0, 0)),              # Mk
            pl.BlockSpec((1, MD), lambda b: (0, 0)),             # Mv0 (flat, lane-dense)
            pl.BlockSpec((M, MD), lambda b: (0, 0)),             # E_w
            pl.BlockSpec((D, MD), lambda b: (0, 0)),             # E_e
            pl.BlockSpec((D, D), lambda b: (0, 0)),              # We
            pl.BlockSpec((1, D), lambda b: (0, 0)),              # be
            pl.BlockSpec((D, D), lambda b: (0, 0)),              # Wa
            pl.BlockSpec((1, D), lambda b: (0, 0)),              # ba
            pl.BlockSpec((2 * D, D), lambda b: (0, 0)),          # Wf
            pl.BlockSpec((1, D), lambda b: (0, 0)),              # bf
            pl.BlockSpec((1, D), lambda b: (0, 0)),              # Wp (row vector)
            pl.BlockSpec((1, 1), lambda b: (0, 0)),              # bp
        ],
        out_specs=[
            pl.BlockSpec((TB, L), lambda b: (b, 0)),             # p
            pl.BlockSpec((TB, L + 1, MD), lambda b: (b, 0, 0)),  # Mv (flat, lane-dense)
        ],
        scratch_shapes=[
            pltpu.VMEM((TB, L, D), jnp.float32),                 # read vectors
        ],
    )

    p, mv_flat = pl.pallas_call(
        _dkvmn_kernel,
        out_shape=(jax.ShapeDtypeStruct((B, L), jnp.float32),
                   jax.ShapeDtypeStruct((B, L + 1, MD), jnp.float32)),
        grid_spec=grid_spec,
        compiler_params=pltpu.CompilerParams(
            dimension_semantics=("parallel",)),    # batch tiles are independent -> megacore
    )(k, v, Mk, Mv0.reshape(1, MD), E_w, E_e,
      We, be.reshape(1, D), Wa, ba.reshape(1, D),
      Wf, bf.reshape(1, D), Wp.reshape(1, D), bp.reshape(1, 1))

    return p, mv_flat.reshape(B, L + 1, M, D)


def dkvmn_reference(q, r, pid, params):
    """Pure-JAX reference mirroring the PyTorch forward."""
    (k_table, pid_table, v_table, Mk, Mv0,
     We, be, Wa, ba, Wf, bf, Wp, bp) = params
    num_q = k_table.shape[0]
    B, L = q.shape
    M, D = Mk.shape
    hp = lax.Precision.HIGHEST

    x = q + num_q * r
    k = k_table[q] + pid_table[pid]
    v = v_table[x] + pid_table[pid]
    w = jax.nn.softmax(jnp.einsum('bld,md->blm', k, Mk, precision=hp), axis=-1)
    e = jax.nn.sigmoid(jnp.einsum('bld,de->ble', v, We, precision=hp) + be)
    a = jnp.tanh(jnp.einsum('bld,de->ble', v, Wa, precision=hp) + ba)

    Mvt = jnp.broadcast_to(Mv0[None], (B, M, D))
    mvs = [Mvt]
    for t in range(L):
        wt = w[:, t][:, :, None]      # [B, M, 1]
        et = e[:, t][:, None, :]      # [B, 1, D]
        at = a[:, t][:, None, :]      # [B, 1, D]
        Mvt = Mvt * (1.0 - wt * et) + wt * at
        mvs.append(Mvt)
    Mv = jnp.stack(mvs, axis=1)                               # [B, L+1, M, D]
    read = jnp.sum(w[..., None] * Mv[:, :-1], axis=-2)        # [B, L, D]
    f = jnp.tanh(jnp.einsum('blc,cd->bld',
                            jnp.concatenate([read, k], axis=-1), Wf, precision=hp) + bf)
    p = jax.nn.sigmoid(jnp.einsum('bld,do->blo', f, Wp, precision=hp) + bp)[..., 0]
    return p, Mv


if __name__ == "__main__":
    num_q, num_pid, dim_s, size_m = 10, 7, 32, 16
    B, L = 2, 8

    key = jax.random.PRNGKey(0)
    ks = jax.random.split(key, 20)

    std = math.sqrt(2.0 / dim_s)          # kaiming_normal_ (fan_in = dim_s)
    lin1 = 1.0 / math.sqrt(dim_s)
    lin2 = 1.0 / math.sqrt(2 * dim_s)

    params = (
        jax.random.normal(ks[0], (num_q, dim_s), jnp.float32) * 0.5,           # k_emb_layer
        jax.random.normal(ks[1], (num_pid, dim_s), jnp.float32) * 0.5,         # pid_emb_layer
        jax.random.normal(ks[2], (num_q * 2, dim_s), jnp.float32) * 0.5,       # v_emb_layer
        jax.random.normal(ks[3], (size_m, dim_s), jnp.float32) * std,          # Mk
        jax.random.normal(ks[4], (size_m, dim_s), jnp.float32) * std,          # Mv0
        jax.random.uniform(ks[5], (dim_s, dim_s), jnp.float32, -lin1, lin1),   # e_layer W (in,out)
        jax.random.uniform(ks[6], (dim_s,), jnp.float32, -lin1, lin1),         # e_layer b
        jax.random.uniform(ks[7], (dim_s, dim_s), jnp.float32, -lin1, lin1),   # a_layer W
        jax.random.uniform(ks[8], (dim_s,), jnp.float32, -lin1, lin1),         # a_layer b
        jax.random.uniform(ks[9], (2 * dim_s, dim_s), jnp.float32, -lin2, lin2),  # f_layer W
        jax.random.uniform(ks[10], (dim_s,), jnp.float32, -lin2, lin2),           # f_layer b
        jax.random.uniform(ks[11], (dim_s, 1), jnp.float32, -lin1, lin1),         # p_layer W
        jax.random.uniform(ks[12], (1,), jnp.float32, -lin1, lin1),               # p_layer b
    )

    q = jax.random.randint(ks[13], (B, L), 0, num_q, dtype=jnp.int32)
    r = jax.random.randint(ks[14], (B, L), 0, 2, dtype=jnp.int32)
    pid = jax.random.randint(ks[15], (B, L), 0, num_pid, dtype=jnp.int32)

    p_k, mv_k = jax.jit(dkvmn_forward)(q, r, pid, params)
    jax.block_until_ready((p_k, mv_k))

    p_r, mv_r = dkvmn_reference(q, r, pid, params)
    np.testing.assert_allclose(np.asarray(p_k), np.asarray(p_r), rtol=2e-3, atol=2e-3)
    np.testing.assert_allclose(np.asarray(mv_k), np.asarray(mv_r), rtol=2e-3, atol=2e-3)

    print("KERNEL_OK")
</pallas_src>

<mosaic_0001>
module attributes {stable_mosaic.version = 11 : i64} {
  func.func @_dkvmn_kernel(%arg0: i32, %arg1: memref<2x8x32xf32, #tpu.memory_space<vmem>>, %arg2: memref<2x8x32xf32, #tpu.memory_space<vmem>>, %arg3: memref<16x32xf32, #tpu.memory_space<vmem>>, %arg4: memref<1x512xf32, #tpu.memory_space<vmem>>, %arg5: memref<16x512xf32, #tpu.memory_space<vmem>>, %arg6: memref<32x512xf32, #tpu.memory_space<vmem>>, %arg7: memref<32x32xf32, #tpu.memory_space<vmem>>, %arg8: memref<1x32xf32, #tpu.memory_space<vmem>>, %arg9: memref<32x32xf32, #tpu.memory_space<vmem>>, %arg10: memref<1x32xf32, #tpu.memory_space<vmem>>, %arg11: memref<64x32xf32, #tpu.memory_space<vmem>>, %arg12: memref<1x32xf32, #tpu.memory_space<vmem>>, %arg13: memref<1x32xf32, #tpu.memory_space<vmem>>, %arg14: memref<1x1xf32, #tpu.memory_space<vmem>>, %arg15: memref<2x8xf32, #tpu.memory_space<vmem>>, %arg16: memref<2x9x512xf32, #tpu.memory_space<vmem>>, %arg17: memref<2x8x32xf32, #tpu.memory_space<vmem>>) attributes {dimension_semantics = [#tpu.dimension_semantics<parallel>], iteration_bounds = array<i64: 1>, scalar_prefetch = 0 : i64, scratch_operands = 1 : i64, tpu.core_type = #tpu.core_type<tc>, window_params = [{transform_indices = @transform_0, window_bounds = array<i64: 2, 8, 32>}, {transform_indices = @transform_1, window_bounds = array<i64: 2, 8, 32>}, {pipeline_mode = #tpu.pipeline_mode<synchronous>, transform_indices = @transform_2, window_bounds = array<i64: 16, 32>}, {pipeline_mode = #tpu.pipeline_mode<synchronous>, transform_indices = @transform_3, window_bounds = array<i64: 1, 512>}, {pipeline_mode = #tpu.pipeline_mode<synchronous>, transform_indices = @transform_4, window_bounds = array<i64: 16, 512>}, {pipeline_mode = #tpu.pipeline_mode<synchronous>, transform_indices = @transform_5, window_bounds = array<i64: 32, 512>}, {pipeline_mode = #tpu.pipeline_mode<synchronous>, transform_indices = @transform_6, window_bounds = array<i64: 32, 32>}, {pipeline_mode = #tpu.pipeline_mode<synchronous>, transform_indices = @transform_7, window_bounds = array<i64: 1, 32>}, {pipeline_mode = #tpu.pipeline_mode<synchronous>, transform_indices = @transform_8, window_bounds = array<i64: 32, 32>}, {pipeline_mode = #tpu.pipeline_mode<synchronous>, transform_indices = @transform_9, window_bounds = array<i64: 1, 32>}, {pipeline_mode = #tpu.pipeline_mode<synchronous>, transform_indices = @transform_10, window_bounds = array<i64: 64, 32>}, {pipeline_mode = #tpu.pipeline_mode<synchronous>, transform_indices = @transform_11, window_bounds = array<i64: 1, 32>}, {pipeline_mode = #tpu.pipeline_mode<synchronous>, transform_indices = @transform_12, window_bounds = array<i64: 1, 32>}, {pipeline_mode = #tpu.pipeline_mode<synchronous>, transform_indices = @transform_13, window_bounds = array<i64: 1, 1>}, {transform_indices = @transform_14, window_bounds = array<i64: 2, 8>}, {transform_indices = @transform_15, window_bounds = array<i64: 2, 9, 512>}]} {
    %c0 = arith.constant 0 : index
    %c0_0 = arith.constant 0 : index
    %c0_1 = arith.constant 0 : index
    %0 = vector.load %arg1[%c0, %c0_0, %c0_1] : memref<2x8x32xf32, #tpu.memory_space<vmem>>, vector<2x8x32xf32>
    %1 = vector.shape_cast %0 : vector<2x8x32xf32> to vector<16x32xf32>
    %c0_2 = arith.constant 0 : index
    %c0_3 = arith.constant 0 : index
    %c0_4 = arith.constant 0 : index
    %2 = vector.load %arg2[%c0_2, %c0_3, %c0_4] : memref<2x8x32xf32, #tpu.memory_space<vmem>>, vector<2x8x32xf32>
    %3 = vector.shape_cast %2 : vector<2x8x32xf32> to vector<16x32xf32>
    %c0_5 = arith.constant 0 : index
    %c0_6 = arith.constant 0 : index
    %4 = vector.load %arg3[%c0_5, %c0_6] : memref<16x32xf32, #tpu.memory_space<vmem>>, vector<16x32xf32>
    %cst = arith.constant dense<0.000000e+00> : vector<16x16xf32>
    %5 = tpu.matmul %1, %4, %cst {dimension_numbers = #tpu.dot_dimension_numbers<[1], [1], [0], [0], [0, 0, 1, 0], [], []>} : vector<16x32xf32>, vector<16x32xf32>, vector<16x16xf32> -> vector<16x16xf32>
    %cst_7 = arith.constant dense<0xFF800000> : vector<16xf32>
    %6 = vector.multi_reduction <maximumf>, %5, %cst_7 [1] : vector<16x16xf32> to vector<16xf32>
    %7 = vector.shape_cast %6 : vector<16xf32> to vector<16x1xf32>
    %8 = vector.broadcast %7 : vector<16x1xf32> to vector<16x16xf32>
    %9 = arith.subf %5, %8 : vector<16x16xf32>
    %10 = math.exp %9 : vector<16x16xf32>
    %cst_8 = arith.constant dense<0.000000e+00> : vector<16xf32>
    %11 = vector.multi_reduction <add>, %10, %cst_8 [1] : vector<16x16xf32> to vector<16xf32>
    %12 = vector.shape_cast %11 : vector<16xf32> to vector<16x1xf32>
    %13 = tpu.reciprocal %12 {approx = true} : vector<16x1xf32> -> vector<16x1xf32>
    %14 = vector.broadcast %13 : vector<16x1xf32> to vector<16x16xf32>
    %15 = arith.mulf %10, %14 : vector<16x16xf32>
    %c0_9 = arith.constant 0 : index
    %c0_10 = arith.constant 0 : index
    %16 = vector.load %arg7[%c0_9, %c0_10] : memref<32x32xf32, #tpu.memory_space<vmem>>, vector<32x32xf32>
    %cst_11 = arith.constant dense<0.000000e+00> : vector<16x32xf32>
    %17 = tpu.matmul %3, %16, %cst_11 {dimension_numbers = #tpu.dot_dimension_numbers<[1], [0], [0], [1], [0, 0, 1, 1], [], []>} : vector<16x32xf32>, vector<32x32xf32>, vector<16x32xf32> -> vector<16x32xf32>
    %c0_12 = arith.constant 0 : index
    %c0_13 = arith.constant 0 : index
    %18 = vector.load %arg8[%c0_12, %c0_13] : memref<1x32xf32, #tpu.memory_space<vmem>>, vector<1x32xf32>
    %19 = vector.broadcast %18 : vector<1x32xf32> to vector<16x32xf32>
    %20 = arith.addf %17, %19 : vector<16x32xf32>
    %21 = arith.negf %20 : vector<16x32xf32>
    %22 = math.exp %21 : vector<16x32xf32>
    %cst_14 = arith.constant 1.000000e+00 : f32
    %23 = vector.broadcast %cst_14 : f32 to vector<16x32xf32>
    %24 = arith.addf %23, %22 : vector<16x32xf32>
    %25 = arith.divf %23, %24 : vector<16x32xf32>
    %c0_15 = arith.constant 0 : index
    %c0_16 = arith.constant 0 : index
    %26 = vector.load %arg9[%c0_15, %c0_16] : memref<32x32xf32, #tpu.memory_space<vmem>>, vector<32x32xf32>
    %cst_17 = arith.constant dense<0.000000e+00> : vector<16x32xf32>
    %27 = tpu.matmul %3, %26, %cst_17 {dimension_numbers = #tpu.dot_dimension_numbers<[1], [0], [0], [1], [0, 0, 1, 1], [], []>} : vector<16x32xf32>, vector<32x32xf32>, vector<16x32xf32> -> vector<16x32xf32>
    %c0_18 = arith.constant 0 : index
    %c0_19 = arith.constant 0 : index
    %28 = vector.load %arg10[%c0_18, %c0_19] : memref<1x32xf32, #tpu.memory_space<vmem>>, vector<1x32xf32>
    %29 = vector.broadcast %28 : vector<1x32xf32> to vector<16x32xf32>
    %30 = arith.addf %27, %29 : vector<16x32xf32>
    %31 = math.tanh %30 : vector<16x32xf32>
    %32 = vector.shape_cast %15 : vector<16x16xf32> to vector<2x8x16xf32>
    %33 = vector.shape_cast %25 : vector<16x32xf32> to vector<2x8x32xf32>
    %34 = vector.shape_cast %31 : vector<16x32xf32> to vector<2x8x32xf32>
    %c0_20 = arith.constant 0 : index
    %c0_21 = arith.constant 0 : index
    %35 = vector.load %arg5[%c0_20, %c0_21] : memref<16x512xf32, #tpu.memory_space<vmem>>, vector<16x512xf32>
    %c0_22 = arith.constant 0 : index
    %c0_23 = arith.constant 0 : index
    %36 = vector.load %arg6[%c0_22, %c0_23] : memref<32x512xf32, #tpu.memory_space<vmem>>, vector<32x512xf32>
    %c0_24 = arith.constant 0 : index
    %c0_25 = arith.constant 0 : index
    %37 = vector.load %arg4[%c0_24, %c0_25] : memref<1x512xf32, #tpu.memory_space<vmem>>, vector<1x512xf32>
    %38 = vector.shape_cast %37 : vector<1x512xf32> to vector<1x512xf32>
    %39 = vector.broadcast %38 : vector<1x512xf32> to vector<2x512xf32>
    %c0_26 = arith.constant 0 : index
    %c0_27 = arith.constant 0 : index
    %c0_28 = arith.constant 0 : index
    %40 = vector.load %arg16[%c0_26, %c0_27, %c0_28] : memref<2x9x512xf32, #tpu.memory_space<vmem>>, vector<2x1x512xf32>
    %41 = vector.shape_cast %40 : vector<2x1x512xf32> to vector<2x512xf32>
    %42 = vector.shape_cast %39 : vector<2x512xf32> to vector<2x1x512xf32>
    tpu.vector_store %arg16[%c0_26, %c0_27, %c0_28], %42 {strides = array<i32>} : memref<2x9x512xf32, #tpu.memory_space<vmem>>, vector<2x1x512xf32>,
    %43 = vector.extract_strided_slice %32 {offsets = [0, 0, 0], sizes = [2, 1, 16], strides = [1, 1, 1]} : vector<2x8x16xf32> to vector<2x1x16xf32>
    %44 = vector.shape_cast %43 : vector<2x1x16xf32> to vector<2x16xf32>
    %45 = vector.extract_strided_slice %33 {offsets = [0, 0, 0], sizes = [2, 1, 32], strides = [1, 1, 1]} : vector<2x8x32xf32> to vector<2x1x32xf32>
    %46 = vector.shape_cast %45 : vector<2x1x32xf32> to vector<2x32xf32>
    %47 = vector.extract_strided_slice %34 {offsets = [0, 0, 0], sizes = [2, 1, 32], strides = [1, 1, 1]} : vector<2x8x32xf32> to vector<2x1x32xf32>
    %48 = vector.shape_cast %47 : vector<2x1x32xf32> to vector<2x32xf32>
    %cst_29 = arith.constant dense<0.000000e+00> : vector<2x512xf32>
    %49 = tpu.matmul %44, %35, %cst_29 {dimension_numbers = #tpu.dot_dimension_numbers<[1], [0], [0], [1], [0, 0, 1, 1], [], []>} : vector<2x16xf32>, vector<16x512xf32>, vector<2x512xf32> -> vector<2x512xf32>
    %cst_30 = arith.constant dense<0.000000e+00> : vector<2x512xf32>
    %50 = tpu.matmul %46, %36, %cst_30 {dimension_numbers = #tpu.dot_dimension_numbers<[1], [0], [0], [1], [0, 0, 1, 1], [], []>} : vector<2x32xf32>, vector<32x512xf32>, vector<2x512xf32> -> vector<2x512xf32>
    %cst_31 = arith.constant dense<0.000000e+00> : vector<2x512xf32>
    %51 = tpu.matmul %48, %36, %cst_31 {dimension_numbers = #tpu.dot_dimension_numbers<[1], [0], [0], [1], [0, 0, 1, 1], [], []>} : vector<2x32xf32>, vector<32x512xf32>, vector<2x512xf32> -> vector<2x512xf32>
    %52 = arith.mulf %49, %39 : vector<2x512xf32>
    %cst_32 = arith.constant dense<0.000000e+00> : vector<2x32xf32>
    %53 = tpu.matmul %52, %36, %cst_32 {dimension_numbers = #tpu.dot_dimension_numbers<[1], [1], [0], [0], [0, 0, 1, 0], [], []>} : vector<2x512xf32>, vector<32x512xf32>, vector<2x32xf32> -> vector<2x32xf32>
    %c0_33 = arith.constant 0 : index
    %c0_34 = arith.constant 0 : index
    %c0_35 = arith.constant 0 : index
    %54 = vector.load %arg17[%c0_33, %c0_34, %c0_35] : memref<2x8x32xf32, #tpu.memory_space<vmem>>, vector<2x1x32xf32>
    %55 = vector.shape_cast %54 : vector<2x1x32xf32> to vector<2x32xf32>
    %56 = vector.shape_cast %53 : vector<2x32xf32> to vector<2x1x32xf32>
    tpu.vector_store %arg17[%c0_33, %c0_34, %c0_35], %56 {strides = array<i32>} : memref<2x8x32xf32, #tpu.memory_space<vmem>>, vector<2x1x32xf32>,
    %57 = arith.mulf %49, %50 : vector<2x512xf32>
    %cst_36 = arith.constant 1.000000e+00 : f32
    %58 = vector.broadcast %cst_36 : f32 to vector<2x512xf32>
    %59 = arith.subf %58, %57 : vector<2x512xf32>
    %60 = arith.mulf %39, %59 : vector<2x512xf32>
    %61 = arith.mulf %49, %51 : vector<2x512xf32>
    %62 = arith.addf %60, %61 : vector<2x512xf32>
    %c0_37 = arith.constant 0 : index
    %c1 = arith.constant 1 : index
    %c0_38 = arith.constant 0 : index
    %63 = vector.load %arg16[%c0_37, %c1, %c0_38] : memref<2x9x512xf32, #tpu.memory_space<vmem>>, vector<2x1x512xf32>
    %64 = vector.shape_cast %63 : vector<2x1x512xf32> to vector<2x512xf32>
    %65 = vector.shape_cast %62 : vector<2x512xf32> to vector<2x1x512xf32>
    tpu.vector_store %arg16[%c0_37, %c1, %c0_38], %65 {strides = array<i32>} : memref<2x9x512xf32, #tpu.memory_space<vmem>>, vector<2x1x512xf32>,
    %66 = vector.extract_strided_slice %32 {offsets = [0, 1, 0], sizes = [2, 1, 16], strides = [1, 1, 1]} : vector<2x8x16xf32> to vector<2x1x16xf32>
    %67 = vector.shape_cast %66 : vector<2x1x16xf32> to vector<2x16xf32>
    %68 = vector.extract_strided_slice %33 {offsets = [0, 1, 0], sizes = [2, 1, 32], strides = [1, 1, 1]} : vector<2x8x32xf32> to vector<2x1x32xf32>
    %69 = vector.shape_cast %68 : vector<2x1x32xf32> to vector<2x32xf32>
    %70 = vector.extract_strided_slice %34 {offsets = [0, 1, 0], sizes = [2, 1, 32], strides = [1, 1, 1]} : vector<2x8x32xf32> to vector<2x1x32xf32>
    %71 = vector.shape_cast %70 : vector<2x1x32xf32> to vector<2x32xf32>
    %cst_39 = arith.constant dense<0.000000e+00> : vector<2x512xf32>
    %72 = tpu.matmul %67, %35, %cst_39 {dimension_numbers = #tpu.dot_dimension_numbers<[1], [0], [0], [1], [0, 0, 1, 1], [], []>} : vector<2x16xf32>, vector<16x512xf32>, vector<2x512xf32> -> vector<2x512xf32>
    %cst_40 = arith.constant dense<0.000000e+00> : vector<2x512xf32>
    %73 = tpu.matmul %69, %36, %cst_40 {dimension_numbers = #tpu.dot_dimension_numbers<[1], [0], [0], [1], [0, 0, 1, 1], [], []>} : vector<2x32xf32>, vector<32x512xf32>, vector<2x512xf32> -> vector<2x512xf32>
    %cst_41 = arith.constant dense<0.000000e+00> : vector<2x512xf32>
    %74 = tpu.matmul %71, %36, %cst_41 {dimension_numbers = #tpu.dot_dimension_numbers<[1], [0], [0], [1], [0, 0, 1, 1], [], []>} : vector<2x32xf32>, vector<32x512xf32>, vector<2x512xf32> -> vector<2x512xf32>
    %75 = arith.mulf %72, %62 : vector<2x512xf32>
    %cst_42 = arith.constant dense<0.000000e+00> : vector<2x32xf32>
    %76 = tpu.matmul %75, %36, %cst_42 {dimension_numbers = #tpu.dot_dimension_numbers<[1], [1], [0], [0], [0, 0, 1, 0], [], []>} : vector<2x512xf32>, vector<32x512xf32>, vector<2x32xf32> -> vector<2x32xf32>
    %c0_43 = arith.constant 0 : index
    %c1_44 = arith.constant 1 : index
    %c0_45 = arith.constant 0 : index
    %77 = vector.load %arg17[%c0_43, %c1_44, %c0_45] : memref<2x8x32xf32, #tpu.memory_space<vmem>>, vector<2x1x32xf32>
    %78 = vector.shape_cast %77 : vector<2x1x32xf32> to vector<2x32xf32>
    %79 = vector.shape_cast %76 : vector<2x32xf32> to vector<2x1x32xf32>
    tpu.vector_store %arg17[%c0_43, %c1_44, %c0_45], %79 {strides = array<i32>} : memref<2x8x32xf32, #tpu.memory_space<vmem>>, vector<2x1x32xf32>,
    %80 = arith.mulf %72, %73 : vector<2x512xf32>
    %cst_46 = arith.constant 1.000000e+00 : f32
    %81 = vector.broadcast %cst_46 : f32 to vector<2x512xf32>
    %82 = arith.subf %81, %80 : vector<2x512xf32>
    %83 = arith.mulf %62, %82 : vector<2x512xf32>
    %84 = arith.mulf %72, %74 : vector<2x512xf32>
    %85 = arith.addf %83, %84 : vector<2x512xf32>
    %c0_47 = arith.constant 0 : index
    %c2 = arith.constant 2 : index
    %c0_48 = arith.constant 0 : index
    %86 = vector.load %arg16[%c0_47, %c2, %c0_48] : memref<2x9x512xf32, #tpu.memory_space<vmem>>, vector<2x1x512xf32>
    %87 = vector.shape_cast %86 : vector<2x1x512xf32> to vector<2x512xf32>
    %88 = vector.shape_cast %85 : vector<2x512xf32> to vector<2x1x512xf32>
    tpu.vector_store %arg16[%c0_47, %c2, %c0_48], %88 {strides = array<i32>} : memref<2x9x512xf32, #tpu.memory_space<vmem>>, vector<2x1x512xf32>,
    %89 = vector.extract_strided_slice %32 {offsets = [0, 2, 0], sizes = [2, 1, 16], strides = [1, 1, 1]} : vector<2x8x16xf32> to vector<2x1x16xf32>
    %90 = vector.shape_cast %89 : vector<2x1x16xf32> to vector<2x16xf32>
    %91 = vector.extract_strided_slice %33 {offsets = [0, 2, 0], sizes = [2, 1, 32], strides = [1, 1, 1]} : vector<2x8x32xf32> to vector<2x1x32xf32>
    %92 = vector.shape_cast %91 : vector<2x1x32xf32> to vector<2x32xf32>
    %93 = vector.extract_strided_slice %34 {offsets = [0, 2, 0], sizes = [2, 1, 32], strides = [1, 1, 1]} : vector<2x8x32xf32> to vector<2x1x32xf32>
    %94 = vector.shape_cast %93 : vector<2x1x32xf32> to vector<2x32xf32>
    %cst_49 = arith.constant dense<0.000000e+00> : vector<2x512xf32>
    %95 = tpu.matmul %90, %35, %cst_49 {dimension_numbers = #tpu.dot_dimension_numbers<[1], [0], [0], [1], [0, 0, 1, 1], [], []>} : vector<2x16xf32>, vector<16x512xf32>, vector<2x512xf32> -> vector<2x512xf32>
    %cst_50 = arith.constant dense<0.000000e+00> : vector<2x512xf32>
    %96 = tpu.matmul %92, %36, %cst_50 {dimension_numbers = #tpu.dot_dimension_numbers<[1], [0], [0], [1], [0, 0, 1, 1], [], []>} : vector<2x32xf32>, vector<32x512xf32>, vector<2x512xf32> -> vector<2x512xf32>
    %cst_51 = arith.constant dense<0.000000e+00> : vector<2x512xf32>
    %97 = tpu.matmul %94, %36, %cst_51 {dimension_numbers = #tpu.dot_dimension_numbers<[1], [0], [0], [1], [0, 0, 1, 1], [], []>} : vector<2x32xf32>, vector<32x512xf32>, vector<2x512xf32> -> vector<2x512xf32>
    %98 = arith.mulf %95, %85 : vector<2x512xf32>
    %cst_52 = arith.constant dense<0.000000e+00> : vector<2x32xf32>
    %99 = tpu.matmul %98, %36, %cst_52 {dimension_numbers = #tpu.dot_dimension_numbers<[1], [1], [0], [0], [0, 0, 1, 0], [], []>} : vector<2x512xf32>, vector<32x512xf32>, vector<2x32xf32> -> vector<2x32xf32>
    %c0_53 = arith.constant 0 : index
    %c2_54 = arith.constant 2 : index
    %c0_55 = arith.constant 0 : index
    %100 = vector.load %arg17[%c0_53, %c2_54, %c0_55] : memref<2x8x32xf32, #tpu.memory_space<vmem>>, vector<2x1x32xf32>
    %101 = vector.shape_cast %100 : vector<2x1x32xf32> to vector<2x32xf32>
    %102 = vector.shape_cast %99 : vector<2x32xf32> to vector<2x1x32xf32>
    tpu.vector_store %arg17[%c0_53, %c2_54, %c0_55], %102 {strides = array<i32>} : memref<2x8x32xf32, #tpu.memory_space<vmem>>, vector<2x1x32xf32>,
    %103 = arith.mulf %95, %96 : vector<2x512xf32>
    %cst_56 = arith.constant 1.000000e+00 : f32
    %104 = vector.broadcast %cst_56 : f32 to vector<2x512xf32>
    %105 = arith.subf %104, %103 : vector<2x512xf32>
    %106 = arith.mulf %85, %105 : vector<2x512xf32>
    %107 = arith.mulf %95, %97 : vector<2x512xf32>
    %108 = arith.addf %106, %107 : vector<2x512xf32>
    %c0_57 = arith.constant 0 : index
    %c3 = arith.constant 3 : index
    %c0_58 = arith.constant 0 : index
    %109 = vector.load %arg16[%c0_57, %c3, %c0_58] : memref<2x9x512xf32, #tpu.memory_space<vmem>>, vector<2x1x512xf32>
    %110 = vector.shape_cast %109 : vector<2x1x512xf32> to vector<2x512xf32>
    %111 = vector.shape_cast %108 : vector<2x512xf32> to vector<2x1x512xf32>
    tpu.vector_store %arg16[%c0_57, %c3, %c0_58], %111 {strides = array<i32>} : memref<2x9x512xf32, #tpu.memory_space<vmem>>, vector<2x1x512xf32>,
    %112 = vector.extract_strided_slice %32 {offsets = [0, 3, 0], sizes = [2, 1, 16], strides = [1, 1, 1]} : vector<2x8x16xf32> to vector<2x1x16xf32>
    %113 = vector.shape_cast %112 : vector<2x1x16xf32> to vector<2x16xf32>
    %114 = vector.extract_strided_slice %33 {offsets = [0, 3, 0], sizes = [2, 1, 32], strides = [1, 1, 1]} : vector<2x8x32xf32> to vector<2x1x32xf32>
    %115 = vector.shape_cast %114 : vector<2x1x32xf32> to vector<2x32xf32>
    %116 = vector.extract_strided_slice %34 {offsets = [0, 3, 0], sizes = [2, 1, 32], strides = [1, 1, 1]} : vector<2x8x32xf32> to vector<2x1x32xf32>
    %117 = vector.shape_cast %116 : vector<2x1x32xf32> to vector<2x32xf32>
    %cst_59 = arith.constant dense<0.000000e+00> : vector<2x512xf32>
    %118 = tpu.matmul %113, %35, %cst_59 {dimension_numbers = #tpu.dot_dimension_numbers<[1], [0], [0], [1], [0, 0, 1, 1], [], []>} : vector<2x16xf32>, vector<16x512xf32>, vector<2x512xf32> -> vector<2x512xf32>
    %cst_60 = arith.constant dense<0.000000e+00> : vector<2x512xf32>
    %119 = tpu.matmul %115, %36, %cst_60 {dimension_numbers = #tpu.dot_dimension_numbers<[1], [0], [0], [1], [0, 0, 1, 1], [], []>} : vector<2x32xf32>, vector<32x512xf32>, vector<2x512xf32> -> vector<2x512xf32>
    %cst_61 = arith.constant dense<0.000000e+00> : vector<2x512xf32>
    %120 = tpu.matmul %117, %36, %cst_61 {dimension_numbers = #tpu.dot_dimension_numbers<[1], [0], [0], [1], [0, 0, 1, 1], [], []>} : vector<2x32xf32>, vector<32x512xf32>, vector<2x512xf32> -> vector<2x512xf32>
    %121 = arith.mulf %118, %108 : vector<2x512xf32>
    %cst_62 = arith.constant dense<0.000000e+00> : vector<2x32xf32>
    %122 = tpu.matmul %121, %36, %cst_62 {dimension_numbers = #tpu.dot_dimension_numbers<[1], [1], [0], [0], [0, 0, 1, 0], [], []>} : vector<2x512xf32>, vector<32x512xf32>, vector<2x32xf32> -> vector<2x32xf32>
    %c0_63 = arith.constant 0 : index
    %c3_64 = arith.constant 3 : index
    %c0_65 = arith.constant 0 : index
    %123 = vector.load %arg17[%c0_63, %c3_64, %c0_65] : memref<2x8x32xf32, #tpu.memory_space<vmem>>, vector<2x1x32xf32>
    %124 = vector.shape_cast %123 : vector<2x1x32xf32> to vector<2x32xf32>
    %125 = vector.shape_cast %122 : vector<2x32xf32> to vector<2x1x32xf32>
    tpu.vector_store %arg17[%c0_63, %c3_64, %c0_65], %125 {strides = array<i32>} : memref<2x8x32xf32, #tpu.memory_space<vmem>>, vector<2x1x32xf32>,
    %126 = arith.mulf %118, %119 : vector<2x512xf32>
    %cst_66 = arith.constant 1.000000e+00 : f32
    %127 = vector.broadcast %cst_66 : f32 to vector<2x512xf32>
    %128 = arith.subf %127, %126 : vector<2x512xf32>
    %129 = arith.mulf %108, %128 : vector<2x512xf32>
    %130 = arith.mulf %118, %120 : vector<2x512xf32>
    %131 = arith.addf %129, %130 : vector<2x512xf32>
    %c0_67 = arith.constant 0 : index
    %c4 = arith.constant 4 : index
    %c0_68 = arith.constant 0 : index
    %132 = vector.load %arg16[%c0_67, %c4, %c0_68] : memref<2x9x512xf32, #tpu.memory_space<vmem>>, vector<2x1x512xf32>
    %133 = vector.shape_cast %132 : vector<2x1x512xf32> to vector<2x512xf32>
    %134 = vector.shape_cast %131 : vector<2x512xf32> to vector<2x1x512xf32>
    tpu.vector_store %arg16[%c0_67, %c4, %c0_68], %134 {strides = array<i32>} : memref<2x9x512xf32, #tpu.memory_space<vmem>>, vector<2x1x512xf32>,
    %135 = vector.extract_strided_slice %32 {offsets = [0, 4, 0], sizes = [2, 1, 16], strides = [1, 1, 1]} : vector<2x8x16xf32> to vector<2x1x16xf32>
    %136 = vector.shape_cast %135 : vector<2x1x16xf32> to vector<2x16xf32>
    %137 = vector.extract_strided_slice %33 {offsets = [0, 4, 0], sizes = [2, 1, 32], strides = [1, 1, 1]} : vector<2x8x32xf32> to vector<2x1x32xf32>
    %138 = vector.shape_cast %137 : vector<2x1x32xf32> to vector<2x32xf32>
    %139 = vector.extract_strided_slice %34 {offsets = [0, 4, 0], sizes = [2, 1, 32], strides = [1, 1, 1]} : vector<2x8x32xf32> to vector<2x1x32xf32>
    %140 = vector.shape_cast %139 : vector<2x1x32xf32> to vector<2x32xf32>
    %cst_69 = arith.constant dense<0.000000e+00> : vector<2x512xf32>
    %141 = tpu.matmul %136, %35, %cst_69 {dimension_numbers = #tpu.dot_dimension_numbers<[1], [0], [0], [1], [0, 0, 1, 1], [], []>} : vector<2x16xf32>, vector<16x512xf32>, vector<2x512xf32> -> vector<2x512xf32>
    %cst_70 = arith.constant dense<0.000000e+00> : vector<2x512xf32>
    %142 = tpu.matmul %138, %36, %cst_70 {dimension_numbers = #tpu.dot_dimension_numbers<[1], [0], [0], [1], [0, 0, 1, 1], [], []>} : vector<2x32xf32>, vector<32x512xf32>, vector<2x512xf32> -> vector<2x512xf32>
    %cst_71 = arith.constant dense<0.000000e+00> : vector<2x512xf32>
    %143 = tpu.matmul %140, %36, %cst_71 {dimension_numbers = #tpu.dot_dimension_numbers<[1], [0], [0], [1], [0, 0, 1, 1], [], []>} : vector<2x32xf32>, vector<32x512xf32>, vector<2x512xf32> -> vector<2x512xf32>
    %144 = arith.mulf %141, %131 : vector<2x512xf32>
    %cst_72 = arith.constant dense<0.000000e+00> : vector<2x32xf32>
    %145 = tpu.matmul %144, %36, %cst_72 {dimension_numbers = #tpu.dot_dimension_numbers<[1], [1], [0], [0], [0, 0, 1, 0], [], []>} : vector<2x512xf32>, vector<32x512xf32>, vector<2x32xf32> -> vector<2x32xf32>
    %c0_73 = arith.constant 0 : index
    %c4_74 = arith.constant 4 : index
    %c0_75 = arith.constant 0 : index
    %146 = vector.load %arg17[%c0_73, %c4_74, %c0_75] : memref<2x8x32xf32, #tpu.memory_space<vmem>>, vector<2x1x32xf32>
    %147 = vector.shape_cast %146 : vector<2x1x32xf32> to vector<2x32xf32>
    %148 = vector.shape_cast %145 : vector<2x32xf32> to vector<2x1x32xf32>
    tpu.vector_store %arg17[%c0_73, %c4_74, %c0_75], %148 {strides = array<i32>} : memref<2x8x32xf32, #tpu.memory_space<vmem>>, vector<2x1x32xf32>,
    %149 = arith.mulf %141, %142 : vector<2x512xf32>
    %cst_76 = arith.constant 1.000000e+00 : f32
    %150 = vector.broadcast %cst_76 : f32 to vector<2x512xf32>
    %151 = arith.subf %150, %149 : vector<2x512xf32>
    %152 = arith.mulf %131, %151 : vector<2x512xf32>
    %153 = arith.mulf %141, %143 : vector<2x512xf32>
    %154 = arith.addf %152, %153 : vector<2x512xf32>
    %c0_77 = arith.constant 0 : index
    %c5 = arith.constant 5 : index
    %c0_78 = arith.constant 0 : index
    %155 = vector.load %arg16[%c0_77, %c5, %c0_78] : memref<2x9x512xf32, #tpu.memory_space<vmem>>, vector<2x1x512xf32>
    %156 = vector.shape_cast %155 : vector<2x1x512xf32> to vector<2x512xf32>
    %157 = vector.shape_cast %154 : vector<2x512xf32> to vector<2x1x512xf32>
    tpu.vector_store %arg16[%c0_77, %c5, %c0_78], %157 {strides = array<i32>} : memref<2x9x512xf32, #tpu.memory_space<vmem>>, vector<2x1x512xf32>,
    %158 = vector.extract_strided_slice %32 {offsets = [0, 5, 0], sizes = [2, 1, 16], strides = [1, 1, 1]} : vector<2x8x16xf32> to vector<2x1x16xf32>
    %159 = vector.shape_cast %158 : vector<2x1x16xf32> to vector<2x16xf32>
    %160 = vector.extract_strided_slice %33 {offsets = [0, 5, 0], sizes = [2, 1, 32], strides = [1, 1, 1]} : vector<2x8x32xf32> to vector<2x1x32xf32>
    %161 = vector.shape_cast %160 : vector<2x1x32xf32> to vector<2x32xf32>
    %162 = vector.extract_strided_slice %34 {offsets = [0, 5, 0], sizes = [2, 1, 32], strides = [1, 1, 1]} : vector<2x8x32xf32> to vector<2x1x32xf32>
    %163 = vector.shape_cast %162 : vector<2x1x32xf32> to vector<2x32xf32>
    %cst_79 = arith.constant dense<0.000000e+00> : vector<2x512xf32>
    %164 = tpu.matmul %159, %35, %cst_79 {dimension_numbers = #tpu.dot_dimension_numbers<[1], [0], [0], [1], [0, 0, 1, 1], [], []>} : vector<2x16xf32>, vector<16x512xf32>, vector<2x512xf32> -> vector<2x512xf32>
    %cst_80 = arith.constant dense<0.000000e+00> : vector<2x512xf32>
    %165 = tpu.matmul %161, %36, %cst_80 {dimension_numbers = #tpu.dot_dimension_numbers<[1], [0], [0], [1], [0, 0, 1, 1], [], []>} : vector<2x32xf32>, vector<32x512xf32>, vector<2x512xf32> -> vector<2x512xf32>
    %cst_81 = arith.constant dense<0.000000e+00> : vector<2x512xf32>
    %166 = tpu.matmul %163, %36, %cst_81 {dimension_numbers = #tpu.dot_dimension_numbers<[1], [0], [0], [1], [0, 0, 1, 1], [], []>} : vector<2x32xf32>, vector<32x512xf32>, vector<2x512xf32> -> vector<2x512xf32>
    %167 = arith.mulf %164, %154 : vector<2x512xf32>
    %cst_82 = arith.constant dense<0.000000e+00> : vector<2x32xf32>
    %168 = tpu.matmul %167, %36, %cst_82 {dimension_numbers = #tpu.dot_dimension_numbers<[1], [1], [0], [0], [0, 0, 1, 0], [], []>} : vector<2x512xf32>, vector<32x512xf32>, vector<2x32xf32> -> vector<2x32xf32>
    %c0_83 = arith.constant 0 : index
    %c5_84 = arith.constant 5 : index
    %c0_85 = arith.constant 0 : index
    %169 = vector.load %arg17[%c0_83, %c5_84, %c0_85] : memref<2x8x32xf32, #tpu.memory_space<vmem>>, vector<2x1x32xf32>
    %170 = vector.shape_cast %169 : vector<2x1x32xf32> to vector<2x32xf32>
    %171 = vector.shape_cast %168 : vector<2x32xf32> to vector<2x1x32xf32>
    tpu.vector_store %arg17[%c0_83, %c5_84, %c0_85], %171 {strides = array<i32>} : memref<2x8x32xf32, #tpu.memory_space<vmem>>, vector<2x1x32xf32>,
    %172 = arith.mulf %164, %165 : vector<2x512xf32>
    %cst_86 = arith.constant 1.000000e+00 : f32
    %173 = vector.broadcast %cst_86 : f32 to vector<2x512xf32>
    %174 = arith.subf %173, %172 : vector<2x512xf32>
    %175 = arith.mulf %154, %174 : vector<2x512xf32>
    %176 = arith.mulf %164, %166 : vector<2x512xf32>
    %177 = arith.addf %175, %176 : vector<2x512xf32>
    %c0_87 = arith.constant 0 : index
    %c6 = arith.constant 6 : index
    %c0_88 = arith.constant 0 : index
    %178 = vector.load %arg16[%c0_87, %c6, %c0_88] : memref<2x9x512xf32, #tpu.memory_space<vmem>>, vector<2x1x512xf32>
    %179 = vector.shape_cast %178 : vector<2x1x512xf32> to vector<2x512xf32>
    %180 = vector.shape_cast %177 : vector<2x512xf32> to vector<2x1x512xf32>
    tpu.vector_store %arg16[%c0_87, %c6, %c0_88], %180 {strides = array<i32>} : memref<2x9x512xf32, #tpu.memory_space<vmem>>, vector<2x1x512xf32>,
    %181 = vector.extract_strided_slice %32 {offsets = [0, 6, 0], sizes = [2, 1, 16], strides = [1, 1, 1]} : vector<2x8x16xf32> to vector<2x1x16xf32>
    %182 = vector.shape_cast %181 : vector<2x1x16xf32> to vector<2x16xf32>
    %183 = vector.extract_strided_slice %33 {offsets = [0, 6, 0], sizes = [2, 1, 32], strides = [1, 1, 1]} : vector<2x8x32xf32> to vector<2x1x32xf32>
    %184 = vector.shape_cast %183 : vector<2x1x32xf32> to vector<2x32xf32>
    %185 = vector.extract_strided_slice %34 {offsets = [0, 6, 0], sizes = [2, 1, 32], strides = [1, 1, 1]} : vector<2x8x32xf32> to vector<2x1x32xf32>
    %186 = vector.shape_cast %185 : vector<2x1x32xf32> to vector<2x32xf32>
    %cst_89 = arith.constant dense<0.000000e+00> : vector<2x512xf32>
    %187 = tpu.matmul %182, %35, %cst_89 {dimension_numbers = #tpu.dot_dimension_numbers<[1], [0], [0], [1], [0, 0, 1, 1], [], []>} : vector<2x16xf32>, vector<16x512xf32>, vector<2x512xf32> -> vector<2x512xf32>
    %cst_90 = arith.constant dense<0.000000e+00> : vector<2x512xf32>
    %188 = tpu.matmul %184, %36, %cst_90 {dimension_numbers = #tpu.dot_dimension_numbers<[1], [0], [0], [1], [0, 0, 1, 1], [], []>} : vector<2x32xf32>, vector<32x512xf32>, vector<2x512xf32> -> vector<2x512xf32>
    %cst_91 = arith.constant dense<0.000000e+00> : vector<2x512xf32>
    %189 = tpu.matmul %186, %36, %cst_91 {dimension_numbers = #tpu.dot_dimension_numbers<[1], [0], [0], [1], [0, 0, 1, 1], [], []>} : vector<2x32xf32>, vector<32x512xf32>, vector<2x512xf32> -> vector<2x512xf32>
    %190 = arith.mulf %187, %177 : vector<2x512xf32>
    %cst_92 = arith.constant dense<0.000000e+00> : vector<2x32xf32>
    %191 = tpu.matmul %190, %36, %cst_92 {dimension_numbers = #tpu.dot_dimension_numbers<[1], [1], [0], [0], [0, 0, 1, 0], [], []>} : vector<2x512xf32>, vector<32x512xf32>, vector<2x32xf32> -> vector<2x32xf32>
    %c0_93 = arith.constant 0 : index
    %c6_94 = arith.constant 6 : index
    %c0_95 = arith.constant 0 : index
    %192 = vector.load %arg17[%c0_93, %c6_94, %c0_95] : memref<2x8x32xf32, #tpu.memory_space<vmem>>, vector<2x1x32xf32>
    %193 = vector.shape_cast %192 : vector<2x1x32xf32> to vector<2x32xf32>
    %194 = vector.shape_cast %191 : vector<2x32xf32> to vector<2x1x32xf32>
    tpu.vector_store %arg17[%c0_93, %c6_94, %c0_95], %194 {strides = array<i32>} : memref<2x8x32xf32, #tpu.memory_space<vmem>>, vector<2x1x32xf32>,
    %195 = arith.mulf %187, %188 : vector<2x512xf32>
    %cst_96 = arith.constant 1.000000e+00 : f32
    %196 = vector.broadcast %cst_96 : f32 to vector<2x512xf32>
    %197 = arith.subf %196, %195 : vector<2x512xf32>
    %198 = arith.mulf %177, %197 : vector<2x512xf32>
    %199 = arith.mulf %187, %189 : vector<2x512xf32>
    %200 = arith.addf %198, %199 : vector<2x512xf32>
    %c0_97 = arith.constant 0 : index
    %c7 = arith.constant 7 : index
    %c0_98 = arith.constant 0 : index
    %201 = vector.load %arg16[%c0_97, %c7, %c0_98] : memref<2x9x512xf32, #tpu.memory_space<vmem>>, vector<2x1x512xf32>
    %202 = vector.shape_cast %201 : vector<2x1x512xf32> to vector<2x512xf32>
    %203 = vector.shape_cast %200 : vector<2x512xf32> to vector<2x1x512xf32>
    tpu.vector_store %arg16[%c0_97, %c7, %c0_98], %203 {strides = array<i32>} : memref<2x9x512xf32, #tpu.memory_space<vmem>>, vector<2x1x512xf32>,
    %204 = vector.extract_strided_slice %32 {offsets = [0, 7, 0], sizes = [2, 1, 16], strides = [1, 1, 1]} : vector<2x8x16xf32> to vector<2x1x16xf32>
    %205 = vector.shape_cast %204 : vector<2x1x16xf32> to vector<2x16xf32>
    %206 = vector.extract_strided_slice %33 {offsets = [0, 7, 0], sizes = [2, 1, 32], strides = [1, 1, 1]} : vector<2x8x32xf32> to vector<2x1x32xf32>
    %207 = vector.shape_cast %206 : vector<2x1x32xf32> to vector<2x32xf32>
    %208 = vector.extract_strided_slice %34 {offsets = [0, 7, 0], sizes = [2, 1, 32], strides = [1, 1, 1]} : vector<2x8x32xf32> to vector<2x1x32xf32>
    %209 = vector.shape_cast %208 : vector<2x1x32xf32> to vector<2x32xf32>
    %cst_99 = arith.constant dense<0.000000e+00> : vector<2x512xf32>
    %210 = tpu.matmul %205, %35, %cst_99 {dimension_numbers = #tpu.dot_dimension_numbers<[1], [0], [0], [1], [0, 0, 1, 1], [], []>} : vector<2x16xf32>, vector<16x512xf32>, vector<2x512xf32> -> vector<2x512xf32>
    %cst_100 = arith.constant dense<0.000000e+00> : vector<2x512xf32>
    %211 = tpu.matmul %207, %36, %cst_100 {dimension_numbers = #tpu.dot_dimension_numbers<[1], [0], [0], [1], [0, 0, 1, 1], [], []>} : vector<2x32xf32>, vector<32x512xf32>, vector<2x512xf32> -> vector<2x512xf32>
    %cst_101 = arith.constant dense<0.000000e+00> : vector<2x512xf32>
    %212 = tpu.matmul %209, %36, %cst_101 {dimension_numbers = #tpu.dot_dimension_numbers<[1], [0], [0], [1], [0, 0, 1, 1], [], []>} : vector<2x32xf32>, vector<32x512xf32>, vector<2x512xf32> -> vector<2x512xf32>
    %213 = arith.mulf %210, %200 : vector<2x512xf32>
    %cst_102 = arith.constant dense<0.000000e+00> : vector<2x32xf32>
    %214 = tpu.matmul %213, %36, %cst_102 {dimension_numbers = #tpu.dot_dimension_numbers<[1], [1], [0], [0], [0, 0, 1, 0], [], []>} : vector<2x512xf32>, vector<32x512xf32>, vector<2x32xf32> -> vector<2x32xf32>
    %c0_103 = arith.constant 0 : index
    %c7_104 = arith.constant 7 : index
    %c0_105 = arith.constant 0 : index
    %215 = vector.load %arg17[%c0_103, %c7_104, %c0_105] : memref<2x8x32xf32, #tpu.memory_space<vmem>>, vector<2x1x32xf32>
    %216 = vector.shape_cast %215 : vector<2x1x32xf32> to vector<2x32xf32>
    %217 = vector.shape_cast %214 : vector<2x32xf32> to vector<2x1x32xf32>
    tpu.vector_store %arg17[%c0_103, %c7_104, %c0_105], %217 {strides = array<i32>} : memref<2x8x32xf32, #tpu.memory_space<vmem>>, vector<2x1x32xf32>,
    %218 = arith.mulf %210, %211 : vector<2x512xf32>
    %cst_106 = arith.constant 1.000000e+00 : f32
    %219 = vector.broadcast %cst_106 : f32 to vector<2x512xf32>
    %220 = arith.subf %219, %218 : vector<2x512xf32>
    %221 = arith.mulf %200, %220 : vector<2x512xf32>
    %222 = arith.mulf %210, %212 : vector<2x512xf32>
    %223 = arith.addf %221, %222 : vector<2x512xf32>
    %c0_107 = arith.constant 0 : index
    %c8 = arith.constant 8 : index
    %c0_108 = arith.constant 0 : index
    %224 = vector.load %arg16[%c0_107, %c8, %c0_108] : memref<2x9x512xf32, #tpu.memory_space<vmem>>, vector<2x1x512xf32>
    %225 = vector.shape_cast %224 : vector<2x1x512xf32> to vector<2x512xf32>
    %226 = vector.shape_cast %223 : vector<2x512xf32> to vector<2x1x512xf32>
    tpu.vector_store %arg16[%c0_107, %c8, %c0_108], %226 {strides = array<i32>} : memref<2x9x512xf32, #tpu.memory_space<vmem>>, vector<2x1x512xf32>,
    %c0_109 = arith.constant 0 : index
    %c0_110 = arith.constant 0 : index
    %227 = vector.load %arg11[%c0_109, %c0_110] : memref<64x32xf32, #tpu.memory_space<vmem>>, vector<64x32xf32>
    %c0_111 = arith.constant 0 : index
    %c0_112 = arith.constant 0 : index
    %c0_113 = arith.constant 0 : index
    %228 = vector.load %arg17[%c0_111, %c0_112, %c0_113] : memref<2x8x32xf32, #tpu.memory_space<vmem>>, vector<2x8x32xf32>
    %229 = vector.shape_cast %228 : vector<2x8x32xf32> to vector<16x32xf32>
    %230 = vector.extract_strided_slice %227 {offsets = [0, 0], sizes = [32, 32], strides = [1, 1]} : vector<64x32xf32> to vector<32x32xf32>
    %cst_114 = arith.constant dense<0.000000e+00> : vector<16x32xf32>
    %231 = tpu.matmul %229, %230, %cst_114 {dimension_numbers = #tpu.dot_dimension_numbers<[1], [0], [0], [1], [0, 0, 1, 1], [], []>} : vector<16x32xf32>, vector<32x32xf32>, vector<16x32xf32> -> vector<16x32xf32>
    %232 = vector.extract_strided_slice %227 {offsets = [32, 0], sizes = [32, 32], strides = [1, 1]} : vector<64x32xf32> to vector<32x32xf32>
    %cst_115 = arith.constant dense<0.000000e+00> : vector<16x32xf32>
    %233 = tpu.matmul %1, %232, %cst_115 {dimension_numbers = #tpu.dot_dimension_numbers<[1], [0], [0], [1], [0, 0, 1, 1], [], []>} : vector<16x32xf32>, vector<32x32xf32>, vector<16x32xf32> -> vector<16x32xf32>
    %234 = arith.addf %231, %233 : vector<16x32xf32>
    %c0_116 = arith.constant 0 : index
    %c0_117 = arith.constant 0 : index
    %235 = vector.load %arg12[%c0_116, %c0_117] : memref<1x32xf32, #tpu.memory_space<vmem>>, vector<1x32xf32>
    %236 = vector.broadcast %235 : vector<1x32xf32> to vector<16x32xf32>
    %237 = arith.addf %234, %236 : vector<16x32xf32>
    %238 = math.tanh %237 : vector<16x32xf32>
    %239 = vector.shape_cast %238 : vector<16x32xf32> to vector<2x8x32xf32>
    %c0_118 = arith.constant 0 : index
    %c0_119 = arith.constant 0 : index
    %240 = vector.load %arg13[%c0_118, %c0_119] : memref<1x32xf32, #tpu.memory_space<vmem>>, vector<1x32xf32>
    %241 = vector.shape_cast %240 : vector<1x32xf32> to vector<1x1x32xf32>
    %242 = vector.broadcast %241 : vector<1x1x32xf32> to vector<2x8x32xf32>
    %243 = arith.mulf %239, %242 : vector<2x8x32xf32>
    %cst_120 = arith.constant dense<0.000000e+00> : vector<2x8xf32>
    %244 = vector.multi_reduction <add>, %243, %cst_120 [2] : vector<2x8x32xf32> to vector<2x8xf32>
    %c0_121 = arith.constant 0 : index
    %c0_122 = arith.constant 0 : index
    %245 = vector.load %arg14[%c0_121, %c0_122] : memref<1x1xf32, #tpu.memory_space<vmem>>, vector<1x1xf32>
    %246 = vector.broadcast %245 : vector<1x1xf32> to vector<2x8xf32>
    %247 = arith.addf %244, %246 : vector<2x8xf32>
    %248 = arith.negf %247 : vector<2x8xf32>
    %249 = math.exp %248 : vector<2x8xf32>
    %cst_123 = arith.constant 1.000000e+00 : f32
    %250 = vector.broadcast %cst_123 : f32 to vector<2x8xf32>
    %251 = arith.addf %250, %249 : vector<2x8xf32>
    %252 = arith.divf %250, %251 : vector<2x8xf32>
    %c0_124 = arith.constant 0 : index
    %c0_125 = arith.constant 0 : index
    %253 = vector.load %arg15[%c0_124, %c0_125] : memref<2x8xf32, #tpu.memory_space<vmem>>, vector<2x8xf32>
    tpu.vector_store %arg15[%c0_124, %c0_125], %252 {strides = array<i32>} : memref<2x8xf32, #tpu.memory_space<vmem>>, vector<2x8xf32>,
    return
  }
  func.func @transform_0(%arg0: i32) -> (i32, i32, i32) {
    %c0_i32 = arith.constant 0 : i32
    %c0_i32_0 = arith.constant 0 : i32
    %c0_i32_1 = arith.constant 0 : i32
    return %arg0, %c0_i32, %c0_i32_0 : i32, i32, i32
  }
  func.func @transform_1(%arg0: i32) -> (i32, i32, i32) {
    %c0_i32 = arith.constant 0 : i32
    %c0_i32_0 = arith.constant 0 : i32
    %c0_i32_1 = arith.constant 0 : i32
    return %arg0, %c0_i32, %c0_i32_0 : i32, i32, i32
  }
  func.func @transform_2(%arg0: i32) -> (i32, i32) {
    %c0_i32 = arith.constant 0 : i32
    %c0_i32_0 = arith.constant 0 : i32
    %c0_i32_1 = arith.constant 0 : i32
    return %c0_i32, %c0_i32_0 : i32, i32
  }
  func.func @transform_3(%arg0: i32) -> (i32, i32) {
    %c0_i32 = arith.constant 0 : i32
    %c0_i32_0 = arith.constant 0 : i32
    %c0_i32_1 = arith.constant 0 : i32
    return %c0_i32, %c0_i32_0 : i32, i32
  }
  func.func @transform_4(%arg0: i32) -> (i32, i32) {
    %c0_i32 = arith.constant 0 : i32
    %c0_i32_0 = arith.constant 0 : i32
    %c0_i32_1 = arith.constant 0 : i32
    return %c0_i32, %c0_i32_0 : i32, i32
  }
  func.func @transform_5(%arg0: i32) -> (i32, i32) {
    %c0_i32 = arith.constant 0 : i32
    %c0_i32_0 = arith.constant 0 : i32
    %c0_i32_1 = arith.constant 0 : i32
    return %c0_i32, %c0_i32_0 : i32, i32
  }
  func.func @transform_6(%arg0: i32) -> (i32, i32) {
    %c0_i32 = arith.constant 0 : i32
    %c0_i32_0 = arith.constant 0 : i32
    %c0_i32_1 = arith.constant 0 : i32
    return %c0_i32, %c0_i32_0 : i32, i32
  }
  func.func @transform_7(%arg0: i32) -> (i32, i32) {
    %c0_i32 = arith.constant 0 : i32
    %c0_i32_0 = arith.constant 0 : i32
    %c0_i32_1 = arith.constant 0 : i32
    return %c0_i32, %c0_i32_0 : i32, i32
  }
  func.func @transform_8(%arg0: i32) -> (i32, i32) {
    %c0_i32 = arith.constant 0 : i32
    %c0_i32_0 = arith.constant 0 : i32
    %c0_i32_1 = arith.constant 0 : i32
    return %c0_i32, %c0_i32_0 : i32, i32
  }
  func.func @transform_9(%arg0: i32) -> (i32, i32) {
    %c0_i32 = arith.constant 0 : i32
    %c0_i32_0 = arith.constant 0 : i32
    %c0_i32_1 = arith.constant 0 : i32
    return %c0_i32, %c0_i32_0 : i32, i32
  }
  func.func @transform_10(%arg0: i32) -> (i32, i32) {
    %c0_i32 = arith.constant 0 : i32
    %c0_i32_0 = arith.constant 0 : i32
    %c0_i32_1 = arith.constant 0 : i32
    return %c0_i32, %c0_i32_0 : i32, i32
  }
  func.func @transform_11(%arg0: i32) -> (i32, i32) {
    %c0_i32 = arith.constant 0 : i32
    %c0_i32_0 = arith.constant 0 : i32
    %c0_i32_1 = arith.constant 0 : i32
    return %c0_i32, %c0_i32_0 : i32, i32
  }
  func.func @transform_12(%arg0: i32) -> (i32, i32) {
    %c0_i32 = arith.constant 0 : i32
    %c0_i32_0 = arith.constant 0 : i32
    %c0_i32_1 = arith.constant 0 : i32
    return %c0_i32, %c0_i32_0 : i32, i32
  }
  func.func @transform_13(%arg0: i32) -> (i32, i32) {
    %c0_i32 = arith.constant 0 : i32
    %c0_i32_0 = arith.constant 0 : i32
    %c0_i32_1 = arith.constant 0 : i32
    return %c0_i32, %c0_i32_0 : i32, i32
  }
  func.func @transform_14(%arg0: i32) -> (i32, i32) {
    %c0_i32 = arith.constant 0 : i32
    %c0_i32_0 = arith.constant 0 : i32
    return %arg0, %c0_i32 : i32, i32
  }
  func.func @transform_15(%arg0: i32) -> (i32, i32, i32) {
    %c0_i32 = arith.constant 0 : i32
    %c0_i32_0 = arith.constant 0 : i32
    %c0_i32_1 = arith.constant 0 : i32
    return %arg0, %c0_i32, %c0_i32_0 : i32, i32, i32
  }
}

</mosaic_0001>

<bundles_post_ra>
// kernel: dkvmn_forward.1
= control target key start
LH: loop header
LB: loop body
LE: loop exit
PB: predicated region body
PF: predicated region fallthrough
CT: control target
= control target key end

     0   :  { %s5385_s0 = inlined_call_operand.vmem [shape: f32[2,8,32], index: 0, kind: input, shape index: {}]   ;;  %s5386_s1 = inlined_call_operand.vmem [shape: f32[2,8,32], index: 1, kind: input, shape index: {}]   ;;  %s5387_s2 = inlined_call_operand.vmem [shape: f32[16,32], index: 2, kind: input, shape index: {}]   ;;  %s5388_s3 = inlined_call_operand.vmem [shape: f32[1,512], index: 3, kind: input, shape index: {}]   ;;  %s5389_s4 = inlined_call_operand.vmem [shape: f32[16,512], index: 4, kind: input, shape index: {}]   ;;  %s5390_s5 = inlined_call_operand.vmem [shape: f32[32,512], index: 5, kind: input, shape index: {}]   ;;  %s5391_s6 = inlined_call_operand.vmem [shape: f32[32,32], index: 6, kind: input, shape index: {}]   ;;  %s5392_s7 = inlined_call_operand.vmem [shape: f32[1,32], index: 7, kind: input, shape index: {}]   ;;  %s5393_s8 = inlined_call_operand.vmem [shape: f32[32,32], index: 8, kind: input, shape index: {}]   ;;  %s5394_s9 = inlined_call_operand.vmem [shape: f32[1,32], index: 9, kind: input, shape index: {}]   ;;  %s5395_s10 = inlined_call_operand.vmem [shape: f32[64,32], index: 10, kind: input, shape index: {}]   ;;  %s5396_s11 = inlined_call_operand.vmem [shape: f32[1,32], index: 11, kind: input, shape index: {}]   ;;  %s5397_s12 = inlined_call_operand.vmem [shape: f32[1,32], index: 12, kind: input, shape index: {}]   ;;  %s5398_s13 = inlined_call_operand.<no memory space> [shape: f32[1,1], index: 13, kind: input, shape index: {}]   ;;  %s5399_s14 = inlined_call_operand.hbm [shape: f32[2,8], index: 14, kind: output, shape index: {0}]   ;;  %s5400_s15 = inlined_call_operand.vmem [shape: f32[2,9,512], index: 15, kind: output, shape index: {1}]  }
   0x1   :  { %v21_v0 = vstv %s5398_s13 }
   0x2   :  { %22 = vst [vmem:[#allocation3] sm:$0x1] %v21_v0 }
   0x3   :  { %v57_v1 = vld [vmem:[%s5387_s2 + $0x8] sm:$0xff]  ;;  %vm58_vm0 = vcmask 261120   ;;  %v56_v2 = vld [vmem:[%s5387_s2] sm:$0xff] }
   0x4   :  { %3534 = vmatpush.xpose.msk.msra.mxu0 %vm58_vm0, %v57_v1 }
   0x5   :  { %23 = vsyncpa [#allocation5], 0  ;;  %v52_v3 = vld [vmem:[%s5385_s0] sm:$0xff]  ;;  %v53_v4 = vld [vmem:[%s5385_s0 + $0x8] sm:$0xff]  ;;  %vm94_vm1 = vcmask 130048   ;;  %vm268_vm10 = vcmask 1041409  }
   0x6   :  { %v120_v5 = vld [vmem:[%s5391_s6 + $0x18] sm:$0xff]  ;;  %v119_v6 = vld [vmem:[%s5391_s6 + $0x10] sm:$0xff]  ;;  %v118_v7 = vld [vmem:[%s5391_s6 + $0x8] sm:$0xff]  ;;  %vm270_vm11 = vcmask 1043459   ;;  %vm262_vm12 = vcmask 1040384   ;;  %vm264_vm13 = vcmask 1042434  }
   0x7   :  { %143 = vmatpush.msra.mxu1 %v120_v5  ;;  %v195_v8 = vld [vmem:[%s5393_s8 + $0x18] sm:$0xff]  ;;  %v194_v9 = vld [vmem:[%s5393_s8 + $0x10] sm:$0xff]  ;;  %v117_v10 = vld [vmem:[%s5391_s6] sm:$0xff]  ;;  %vm272_vm14 = vcmask 1042433   ;;  %vm266_vm15 = vcmask 1041408  }
   0x8   :  { %3535 = vmatpush.xpose.msk.msra.mxu0 %vm58_vm0, %v56_v2  ;;  %212 = vmatpush.msra.mxu2 %v195_v8  ;;  %v193_v11 = vld [vmem:[%s5393_s8 + $0x8] sm:$0xff]  ;;  %v54_v12 = vld [vmem:[%s5386_s1] sm:$0xff]  ;;  %v4145_v60 = vld [vmem:[%s5390_s5 + $0x30] sm:$0xff] }
   0x9   :  { %144 = vmatpush.msra.mxu1 %v119_v6  ;;  %v192_v13 = vld [vmem:[%s5393_s8] sm:$0xff]  ;;  %v55_v14 = vld [vmem:[%s5386_s1 + $0x8] sm:$0xff]  ;;  %v3948_v6 = vld [vmem:[%s5389_s4 + $0x38] sm:$0xff] }
   0xa   :  { %213 = vmatpush.msra.mxu2 %v194_v9  ;;  %v3666_v30 = vld [vmem:[%s5392_s7] ss:$0 sm:$0xff]  ;;  %v3923_v61 = vld [vmem:[%s5390_s5 + $0x68] sm:$0xff]  ;;  %v3965_v9 = vld [vmem:[%s5389_s4 + $0x18] sm:$0xff] }
   0xb   :  { %3536 = vmatmul.msk.f32.vlgmr.msra.gmra.mxu0 %vm58_vm0, %v52_v3  ;;  %145 = vmatpush.msra.mxu1 %v118_v7  ;;  %v3667_v53 = vld [vmem:[%s5394_s9] ss:$0 sm:$0xff]  ;;  %v3931_v2 = vld [vmem:[%s5390_s5 + $0x48] sm:$0xff]  ;;  %s3521_s9 = sshll.u32 %s5399_s14, 4  ;;  %s3522_s9 = int_to_ptr.hbm [resolvable:$true] %s3521_s9 }
   0xc   :  { %214 = vmatpush.msra.mxu2 %v193_v11  ;;  %v3943_v5 = vld [vmem:[%s5389_s4 + $0x20] sm:$0xff]  ;;  %v3953_v7 = vld [vmem:[%s5390_s5 + $0x28] sm:$0xff]  ;;  %366 = vmatpush.msrb.mxu0 %v3948_v6 }
   0xd   :  { %146 = vmatpush.msra.mxu1 %v117_v10  ;;  %306 = vmatpush.msra.mxu3 %v3943_v5  ;;  %v3960_v8 = vld [vmem:[%s5389_s4] sm:$0xff]  ;;  %v3970_v10 = vld [vmem:[%s5390_s5 + $0x8] sm:$0xff] }
   0xe   :  { %3538 = vmatmul.msk.f32.vlgmr.msra.gmra.mxu1 %vm58_vm0, %v54_v12  ;;  %215 = vmatpush.msra.mxu2 %v192_v13 }
   0xf   :  { %3542 = vmatmul.msk.f32.vlgmr.msra.gmra.mxu2 %vm58_vm0, %v54_v12  ;;  %v3977_v12 = vld [vmem:[%s5390_s5 + $0x60] sm:$0xff]  ;;  %307 = vmatpush.msra.mxu3 %v3960_v8 }
  0x10   :  { %410 = vmatpush.msrb.mxu2 %v3923_v61  ;;  %367 = vmatpush.msrb.mxu0 %v3965_v9 }
  0x11   :  { %476 = vmatpush.msrb.mxu1 %v3977_v12 }
  0x12   :  { %411 = vmatpush.msrb.mxu2 %v3931_v2 }
  0x13   :  { %3537 = vmatmul.msk.f32.gmra.mxu0 %vm58_vm0, %v53_v4 }
  0x14   :  { %412 = vmatpush.msrb.mxu2 %v3953_v7 }
  0x16   :  { %3539 = vmatmul.msk.f32.gmra.mxu1 %vm58_vm0, %v55_v14  ;;  %413 = vmatpush.msrb.mxu2 %v3970_v10 }
  0x17   :  { %3543 = vmatmul.msk.f32.gmra.mxu2 %vm58_vm0, %v55_v14 }
  0x18   :  { %496 = vmatpush.msra.mxu2 %v3923_v61 }
  0x1a   :  { %497 = vmatpush.msra.mxu2 %v3931_v2 }
  0x1c   :  { %498 = vmatpush.msra.mxu2 %v3953_v7 }
  0x1e   :  { %499 = vmatpush.msra.mxu2 %v3970_v10 }
  0x88   :  { %v88_v15 = vpop.f32.mrf.mxu0 }
  0x89   :  { %v95_v18 = vsel %vm94_vm1, %v88_v15, -inf }
  0x8b   :  { %v148_v29 = vpop.f32.mrf.mxu1 }
  0x8c   :  { %v149_v33 = vadd.f32 %v3666_v30, %v148_v29  ;;  %v4053_v29 = vld [vmem:[%s5390_s5 + $0x18] sm:$0xff] }
  0x8e   :  { %v3540_v35 = vmul.f32 -1.442695, %v149_v33 }
  0x90   :  { %v91_v16 = vpop.f32.mrf.mxu0 }
  0x91   :  { %v98_v17 = vsel %vm94_vm1, %v91_v16, -inf }
  0x92   :  { %99 = vmax.xlane.f32.xlu0 %v98_v17  ;;  %v217_v47 = vpop.f32.mrf.mxu2  ;;  %v4004_v17 = vld [vmem:[%s5390_s5 + $0x40] sm:$0xff] }
  0x93   :  { %v151_v31 = vpop.f32.mrf.mxu1  ;;  %v218_v59 = vadd.f32 %v3667_v53, %v217_v47  ;;  %477 = vmatpush.msrb.mxu1 %v4004_v17 }
  0x94   :  { %v152_v32 = vadd.f32 %v3666_v30, %v151_v31 }
  0x96   :  { %v3541_v34 = vmul.f32 -1.442695, %v152_v32 }
  0x9a   :  { %96 = vmax.xlane.f32.xlu0 %v95_v18  ;;  %v220_v62 = vpop.f32.mrf.mxu2 }
  0x9b   :  { %v221_v1 = vadd.f32 %v3667_v53, %v220_v62  ;;  %v4151_v62 = vld [vmem:[%s5390_s5 + $0x10] sm:$0xff] }
 0x105   :  { %v100_v19 = vpop.xlane.xlu0 %99 }
 0x106   :  { %v102_v20 = vsub.f32 %v91_v16, %v100_v19  ;;  %v3999_v16 = vld [vmem:[%s5390_s5 + $0x78] sm:$0xff] }
 0x107   :  { %v4014_v19 = vld [vmem:[%s5390_s5 + $0x58] sm:$0xff]  ;;  %450 = vmatpush.msra.mxu0 %v3999_v16 }
 0x108   :  { %v105_v21 = vmul.f32 1.442695, %v102_v20  ;;  %v4019_v20 = vld [vmem:[%s5390_s5 + $0x20] sm:$0xff] }
 0x109   :  { %451 = vmatpush.msra.mxu0 %v4014_v19  ;;  %478 = vmatpush.msrb.mxu1 %v4019_v20 }
 0x10a   :  { %3671 = vpow2.f32 %v105_v21  ;;  %v4024_v21 = vld [vmem:[%s5389_s4 + $0x8] sm:$0xff] }
 0x10d   :  { %v97_v22 = vpop.xlane.xlu0 %96 }
 0x10e   :  { %v101_v23 = vsub.f32 %v88_v15, %v97_v22  ;;  %v3994_v15 = vld [vmem:[%s5389_s4 + $0x28] sm:$0xff] }
 0x10f   :  { %326 = vmatpush.msrb.mxu3 %v3994_v15 }
 0x110   :  { %v3896_v24 = vpop.eup %3671  ;;  %v103_v25 = vmul.f32 1.442695, %v101_v23  ;;  %v4035_v23 = vld [vmem:[%s5390_s5 + $0x38] sm:$0xff] }
 0x111   :  { %v110_v26 = vsel %vm94_vm1, %v3896_v24, 0.0  ;;  %327 = vmatpush.msrb.mxu3 %v4024_v21  ;;  %452 = vmatpush.msra.mxu0 %v4035_v23 }
 0x112   :  { %3673 = vpow2.f32 %v103_v25  ;;  %111 = vadd.xlane.f32.xlu1 %v110_v26  ;;  %v4040_v25 = vld [vmem:[%s5390_s5] sm:$0xff] }
 0x113   :  { %3675 = vpow2.f32 %v3541_v34  ;;  %479 = vmatpush.msrb.mxu1 %v4040_v25  ;;  %453 = vmatpush.msra.mxu0 %v4053_v29 }
 0x114   :  { %3677 = vpow2.f32 %v3540_v35 }
 0x115   :  { %560 = vmatpush.xpose.msra.mxu1 %v3977_v12 }
 0x118   :  { %v3900_v27 = vpop.eup %3673 }
 0x119   :  { %v107_v28 = vsel %vm94_vm1, %v3900_v27, 0.0  ;;  %v3676_v36 = vpop.eup %3675  ;;  %561 = vmatpush.xpose.msra.mxu1 %v4004_v17 }
 0x11a   :  { %108 = vadd.xlane.f32.xlu1 %v107_v28  ;;  %v161_v37 = vadd.f32 1.0, %v3676_v36  ;;  %v3678_v38 = vpop.eup %3677 }
 0x11b   :  { %v160_v39 = vadd.f32 1.0, %v3678_v38 }
 0x11c   :  { %3679 = vrcp.f32 %v161_v37  ;;  %vm182_vm2 = vweird.f32 %v161_v37  ;;  %v188_v48 = vand.u32 2147483648, %v161_v37  ;;  %v186_v51 = vand.u32 2147483647, %v161_v37 }
 0x11d   :  { %3681 = vrcp.f32 %v160_v39  ;;  %vm167_vm5 = vweird.f32 %v160_v39  ;;  %v171_v54 = vand.u32 2147483647, %v160_v39  ;;  %v173_v55 = vand.u32 2147483648, %v160_v39  ;;  %562 = vmatpush.xpose.msra.mxu1 %v4019_v20 }
 0x11e   :  { %v189_v56 = vor.u32 1.1754944e-38, %v188_v48  ;;  %vm187_vm7 = vcmp.eq.f32.partialorder %v186_v51, 8.507059e+37  ;;  %3683 = vtanh.f32 %v218_v59  ;;  %v4138_v59 = vld [vmem:[%s5390_s5 + $0x50] sm:$0xff] }
 0x11f   :  { %v174_v63 = vor.u32 1.1754944e-38, %v173_v55  ;;  %vm3935_vm9 = vcmp.eq.f32.partialorder %v171_v54, 8.507059e+37  ;;  %3685 = vtanh.f32 %v221_v1 }
 0x121   :  { %563 = vmatpush.xpose.msra.mxu1 %v4040_v25 }
 0x122   :  { %v3680_v40 = vpop.eup %3679 }
 0x123   :  { %v178_v41 = vmul.f32 %v3680_v40, %v161_v37  ;;  %v3682_v42 = vpop.eup %3681  ;;  %vm183_vm3 = vweird.f32 %v3680_v40 }
 0x124   :  { %v163_v43 = vmul.f32 %v3682_v42, %v160_v39  ;;  %vm3907_vm4 = vmor %vm182_vm2, %vm183_vm3  ;;  %vm168_vm6 = vweird.f32 %v3682_v42  ;;  %v4006_v18 = vpop.eup %3683  ;;  %v4081_v39 = vld [vmem:[%s5389_s4 + $0x30] sm:$0xff]  ;;  %vm631_vm3 = vcmask 253952  }
 0x125   :  { %v179_v44 = vsub.f32 1.0, %v178_v41  ;;  %vm3916_vm8 = vmor %vm167_vm5, %vm168_vm6  ;;  %v4026_v22 = vpop.eup %3685 }
 0x126   :  { %v164_v45 = vsub.f32 1.0, %v163_v43  ;;  %v460_v26 = vrot.slane %v4026_v22, 7 }
 0x127   :  { %v180_v46 = vmul.f32 %v3680_v40, %v179_v44 }
 0x128   :  { %v165_v49 = vmul.f32 %v3682_v42, %v164_v45  ;;  %v4048_v28 = vsel %vm268_vm10, %v460_v26, %v4006_v18 }
 0x129   :  { %v181_v50 = vadd.f32 %v3680_v40, %v180_v46  ;;  %3553 = vmatmul.msk.f32.vlgmr.msrb.gmra.mxu1 %vm58_vm0, %v4048_v28 }
 0x12a   :  { %v166_v57 = vadd.f32 %v3682_v42, %v165_v49  ;;  %694 = vmatpush.msrb.mxu1 %v3943_v5 }
 0x12b   :  { %v185_v58 = vsel %vm3907_vm4, %v3680_v40, %v181_v50 }
 0x12c   :  { %v3926_v0 = vsel %vm187_vm7, %v189_v56, %v185_v58  ;;  %v170_v3 = vsel %vm3916_vm8, %v3682_v42, %v166_v57  ;;  %695 = vmatpush.msrb.mxu1 %v3960_v8  ;;  %v4129_v58 = vld [vmem:[%s5390_s5 + $0x70] sm:$0xff] }
 0x12d   :  { %v374_v11 = vrot.slane %v3926_v0, 7  ;;  %v3981_v13 = vsel %vm3935_vm9, %v174_v63, %v170_v3  ;;  %v249_v63 = vld [vmem:[%s5388_s3] sm:$0xf] }
 0x12e   :  { %v4177_v1 = vperm.slane %v249_v63, 3 }
 0x12f   :  { %v3987_v14 = vsel %vm268_vm10, %v374_v11, %v3981_v13  ;;  %v4183_v11 = vperm.slane %v249_v63, 0 }
 0x130   :  { %3550 = vmatmul.msk.f32.vlgmr.msrb.gmra.mxu2 %vm58_vm0, %v3987_v14 }
 0x131   :  { %580 = vmatpush.xpose.msrb.mxu2 %v3923_v61 }
 0x135   :  { %581 = vmatpush.xpose.msrb.mxu2 %v3931_v2 }
 0x138   :  { %3554 = vmatmul.msk.f32.vlgmr.msra.gmra.mxu2 %vm58_vm0, %v4048_v28 }
 0x139   :  { %582 = vmatpush.xpose.msrb.mxu2 %v3953_v7 }
 0x13d   :  { %583 = vmatpush.xpose.msrb.mxu2 %v3970_v10 }
 0x141   :  { %714 = vmatpush.msra.mxu2 %v3994_v15 }
 0x143   :  { %715 = vmatpush.msra.mxu2 %v4024_v21 }
 0x185   :  { %v112_v30 = vpop.xlane.xlu1 %111 }
 0x186   :  { %3687 = vrcp.f32 %v112_v30  ;;  %v4194_v30 = vperm.slane %v249_v63, 2 }
 0x18c   :  { %v3688_v32 = vpop.eup %3687 }
 0x18d   :  { %v109_v31 = vpop.xlane.xlu1 %108  ;;  %v116_v33 = vmul.f32 %v3688_v32, %v3896_v24 }
 0x18e   :  { %3689 = vrcp.f32 %v109_v31  ;;  %v261_v31 = vrot.slane %v4177_v1, 5 }
 0x18f   :  { %v288_v36 = vrot.slane %v116_v33, 7  ;;  %v1060_v37 = vrot.slane %v116_v33, 1  ;;  %v1446_v38 = vrot.slane %v116_v33, 2  ;;  %v1832_v40 = vrot.slane %v116_v33, 3 }
 0x190   :  { %v2218_v41 = vrot.slane %v116_v33, 4  ;;  %v2604_v42 = vrot.slane %v116_v33, 5  ;;  %v2990_v43 = vrot.slane %v116_v33, 6 }
 0x194   :  { %v3690_v34 = vpop.eup %3689 }
 0x195   :  { %v115_v35 = vmul.f32 %v3690_v34, %v3900_v27  ;;  %v4089_v27 = vld [vmem:[%s5389_s4 + $0x10] sm:$0xff]  ;;  %v760_v34 = vrot.slane %v3981_v13, 1 }
 0x197   :  { %v289_v44 = vsel %vm268_vm10, %v288_v36, %v115_v35  ;;  %v676_v24 = vrot.slane %v115_v35, 1  ;;  %v1059_v45 = vrot.slane %v115_v35, 2  ;;  %v1445_v46 = vrot.slane %v115_v35, 3 }
 0x198   :  { %3545 = vmatmul.msk.f32.vlgmr.msra.gmra.mxu3 %vm94_vm1, %v289_v44  ;;  %3548 = vmatmul.msk.f32.vlgmr.msrb.gmra.mxu0 %vm94_vm1, %v289_v44  ;;  %v1831_v47 = vrot.slane %v115_v35, 4  ;;  %v2217_v48 = vrot.slane %v115_v35, 5  ;;  %v2603_v49 = vrot.slane %v115_v35, 6  ;;  %v2989_v50 = vrot.slane %v115_v35, 7 }
 0x199   :  { %346 = vmatpush.msra.mxu3 %v4081_v39  ;;  %536 = vmatpush.msrb.mxu0 %v3999_v16  ;;  %v4094_v51 = vsel %vm268_vm10, %v116_v33, %v676_v24  ;;  %v4097_v52 = vsel %vm268_vm10, %v1060_v37, %v1059_v45  ;;  %v4100_v53 = vsel %vm268_vm10, %v1446_v38, %v1445_v46  ;;  %v260_v33 = vrot.slane %v4194_v30, 6 }
 0x19a   :  { %v4103_v54 = vsel %vm268_vm10, %v1832_v40, %v1831_v47  ;;  %v4106_v55 = vsel %vm268_vm10, %v2218_v41, %v2217_v48  ;;  %v4109_v56 = vsel %vm268_vm10, %v2604_v42, %v2603_v49  ;;  %v4112_v57 = vsel %vm268_vm10, %v2990_v43, %v2989_v50  ;;  %v3376_v49 = vld [vmem:[%s5395_s10 + $0x8] sm:$0xff] }
 0x19b   :  { %537 = vmatpush.msrb.mxu0 %v4014_v19  ;;  %347 = vmatpush.msra.mxu3 %v4089_v27  ;;  %v271_v38 = vsel %vm270_vm11, %v260_v33, %v261_v31  ;;  %v4221_v40 = vsel %vm268_vm10, %v3926_v0, %v760_v34  ;;  %v265_v42 = vsel %vm264_vm13, %v260_v33, %v261_v31  ;;  %v277_v45 = vlaneseq }
 0x19c   :  { %v844_v47 = vrot.slane %v4006_v18, 1 }
 0x19d   :  { %538 = vmatpush.msrb.mxu0 %v4035_v23  ;;  %vm4244_vm2 = vcmp.lt.s32.totalorder %v277_v45, 512 }
 0x19e   :  { %v4265_v50 = vsel %vm268_vm10, %v4026_v22, %v844_v47 }
 0x19f   :  { %539 = vmatpush.msrb.mxu0 %v4053_v29 }
 0x1a0   :  { %3546 = vmatmul.msk.f32.vlgmr.msrb.gmra.mxu3 %vm94_vm1, %v289_v44  ;;  %3552 = vmatmul.msk.f32.vlgmr.msra.gmra.mxu0 %vm58_vm0, %v3987_v14 }
 0x1a1   :  { %390 = vmatpush.msrb.mxu3 %v3977_v12  ;;  %620 = vmatpush.xpose.msra.mxu0 %v3999_v16 }
 0x1a3   :  { %391 = vmatpush.msrb.mxu3 %v4004_v17 }
 0x1a5   :  { %392 = vmatpush.msrb.mxu3 %v4019_v20  ;;  %621 = vmatpush.xpose.msra.mxu0 %v4014_v19 }
 0x1a7   :  { %393 = vmatpush.msrb.mxu3 %v4040_v25 }
 0x1a8   :  { %3547 = vmatmul.msk.f32.vlgmr.msra.gmra.mxu3 %vm94_vm1, %v289_v44  ;;  %3556 = vmatmul.msk.f32.vlgmr.msrb.gmra.mxu0 %vm58_vm0, %v4048_v28 }
 0x1a9   :  { %430 = vmatpush.msra.mxu3 %v4129_v58  ;;  %622 = vmatpush.xpose.msra.mxu0 %v4035_v23 }
 0x1ab   :  { %431 = vmatpush.msra.mxu3 %v4138_v59 }
 0x1ad   :  { %432 = vmatpush.msra.mxu3 %v4145_v60  ;;  %623 = vmatpush.xpose.msra.mxu0 %v4053_v29 }
 0x1af   :  { %433 = vmatpush.msra.mxu3 %v4151_v62 }
 0x1b0   :  { %3549 = vmatmul.msk.f32.vlgmr.msrb.gmra.mxu3 %vm58_vm0, %v3987_v14 }
 0x1b1   :  { %754 = vmatpush.msrb.mxu0 %v3948_v6  ;;  %516 = vmatpush.msrb.mxu3 %v4129_v58 }
 0x1b3   :  { %755 = vmatpush.msrb.mxu0 %v3965_v9  ;;  %517 = vmatpush.msrb.mxu3 %v4138_v59 }
 0x1b5   :  { %518 = vmatpush.msrb.mxu3 %v4145_v60 }
 0x1b7   :  { %519 = vmatpush.msrb.mxu3 %v4151_v62 }
 0x1b8   :  { %3551 = vmatmul.msk.f32.vlgmr.msra.gmra.mxu3 %vm58_vm0, %v3987_v14 }
 0x1b9   :  { %600 = vmatpush.xpose.msra.mxu3 %v4129_v58 }
 0x1bd   :  { %601 = vmatpush.xpose.msra.mxu3 %v4138_v59 }
 0x1c0   :  { %3555 = vmatmul.msk.f32.vlgmr.msrb.gmra.mxu3 %vm58_vm0, %v4048_v28  ;;  %v4192_v28 = vperm.slane %v249_v63, 1 }
 0x1c1   :  { %602 = vmatpush.xpose.msra.mxu3 %v4145_v60 }
 0x1c2   :  { %v259_v32 = vrot.slane %v4192_v28, 7 }
 0x1c4   :  { %v269_v36 = vsel %vm268_vm10, %v4183_v11, %v259_v32  ;;  %v263_v41 = vsel %vm262_vm12, %v4183_v11, %v259_v32 }
 0x1c5   :  { %603 = vmatpush.xpose.msra.mxu3 %v4151_v62  ;;  %v273_v43 = vsel %vm272_vm14, %v269_v36, %v271_v38  ;;  %v267_v44 = vsel %vm266_vm15, %v263_v41, %v265_v42 }
 0x1c6   :  { %v274_v24 = vrot.slane %v273_v43, 1  ;;  %281 = vst.msk [vmem:[%s5400_s15] ss:$8 sm:$0xf] %vm4244_vm2, %v267_v44  ;;  %v481_v44 = vpop.f32.mrf.mxu1 }
 0x1c8   :  { %3544 = vst.msk [vmem:[%s5400_s15 + $0x40] ss:$8 sm:$0xf] %vm4244_vm2, %v274_v24 }
 0x1c9   :  { %734 = vmatpush.msrb.mxu3 %v4081_v39 }
 0x1cb   :  { %735 = vmatpush.msrb.mxu3 %v4089_v27 }
 0x215   :  { %v4179_v3 = vpop.f32.mrf.mxu0 }
 0x216   :  { %v547_v4 = vmul.f32 %v4179_v3, %v4177_v1 }
 0x218   :  { %624 = vmatmul.f32.vlgmr.msra.gmra.mxu0 %v547_v4 }
 0x219   :  { %836 = vmatpush.msra.mxu0 %v3999_v16 }
 0x21b   :  { %v4186_v14 = vpop.f32.mrf.mxu3  ;;  %837 = vmatpush.msra.mxu0 %v4014_v19 }
 0x21c   :  { %v544_v26 = vmul.f32 %v4186_v14, %v4183_v11 }
 0x21d   :  { %838 = vmatpush.msra.mxu0 %v4035_v23  ;;  %v455_v63 = vpop.f32.mrf.mxu0 }
 0x21e   :  { %564 = vmatmul.f32.vlgmr.msra.gmra.mxu1 %v544_v26  ;;  %v415_v26 = vpop.f32.mrf.mxu2  ;;  %v637_v32 = vmul.f32 %v455_v63, %v4179_v3  ;;  %v646_v63 = vmul.f32 %v481_v44, %v4186_v14 }
 0x21f   :  { %776 = vmatpush.msra.mxu1 %v3977_v12  ;;  %839 = vmatpush.msra.mxu0 %v4053_v29 }
 0x220   :  { %3562 = vmatmul.msk.f32.vlgmr.msrb.gmra.mxu0 %vm94_vm1, %v4094_v51  ;;  %v641_v38 = vsub.f32 1.0, %v637_v32 }
 0x221   :  { %777 = vmatpush.msra.mxu1 %v4004_v17  ;;  %920 = vmatpush.msrb.mxu0 %v3999_v16 }
 0x223   :  { %v4206_v35 = vpop.f32.mrf.mxu3  ;;  %778 = vmatpush.msra.mxu1 %v4019_v20  ;;  %921 = vmatpush.msrb.mxu0 %v4014_v19 }
 0x224   :  { %v545_v37 = vmul.f32 %v4206_v35, %v4192_v28  ;;  %v635_v31 = vmul.f32 %v415_v26, %v4206_v35 }
 0x225   :  { %779 = vmatpush.msra.mxu1 %v4040_v25  ;;  %922 = vmatpush.msrb.mxu0 %v4035_v23  ;;  %v541_v36 = vpop.f32.mrf.mxu0 }
 0x226   :  { %584 = vmatmul.f32.vlgmr.msrb.gmra.mxu2 %v545_v37  ;;  %3559 = vmatmul.msk.f32.vlgmr.msrb.gmra.mxu1 %vm94_vm1, %v4094_v51  ;;  %v639_v34 = vsub.f32 1.0, %v635_v31  ;;  %v501_v42 = vpop.f32.mrf.mxu2  ;;  %v649_v43 = vmul.f32 %v541_v36, %v4179_v3 }
 0x227   :  { %796 = vmatpush.msrb.mxu2 %v3923_v61  ;;  %860 = vmatpush.msrb.mxu1 %v3977_v12 }
 0x228   :  { %3566 = vmatmul.msk.f32.vlgmr.msra.gmra.mxu0 %vm58_vm0, %v4221_v40  ;;  %v643_v24 = vmul.f32 %v639_v34, %v4192_v28 }
 0x229   :  { %923 = vmatpush.msrb.mxu0 %v4053_v29  ;;  %797 = vmatpush.msrb.mxu2 %v3931_v2 }
 0x22a   :  { %861 = vmatpush.msrb.mxu1 %v4004_v17 }
 0x22b   :  { %1004 = vmatpush.xpose.msra.mxu0 %v3999_v16  ;;  %v4236_v46 = vpop.f32.mrf.mxu3  ;;  %798 = vmatpush.msrb.mxu2 %v3953_v7 }
 0x22c   :  { %v546_v48 = vmul.f32 %v4236_v46, %v4194_v30  ;;  %862 = vmatpush.msrb.mxu1 %v4019_v20 }
 0x22d   :  { %799 = vmatpush.msrb.mxu2 %v3970_v10 }
 0x22e   :  { %604 = vmatmul.f32.vlgmr.msra.gmra.mxu3 %v546_v48  ;;  %3560 = vmatmul.msk.f32.vlgmr.msra.gmra.mxu2 %vm94_vm1, %v4094_v51  ;;  %v647_v48 = vmul.f32 %v501_v42, %v4206_v35 }
 0x22f   :  { %3563 = vmatmul.msk.f32.vlgmr.msra.gmra.mxu1 %vm58_vm0, %v4221_v40  ;;  %816 = vmatpush.msra.mxu3 %v4129_v58 }
 0x230   :  { %3570 = vmatmul.msk.f32.vlgmr.msrb.gmra.mxu0 %vm58_vm0, %v4265_v50  ;;  %863 = vmatpush.msrb.mxu1 %v4040_v25  ;;  %v4317_v26 = vadd.f32 %v647_v48, %v643_v24  ;;  %v1145_v48 = vrot.slane %v3926_v0, 1 }
 0x231   :  { %880 = vmatpush.msra.mxu2 %v3923_v61  ;;  %817 = vmatpush.msra.mxu3 %v4138_v59 }
 0x232   :  { %1005 = vmatpush.xpose.msra.mxu0 %v4014_v19  ;;  %944 = vmatpush.xpose.msra.mxu1 %v3977_v12 }
 0x233   :  { %v395_v4 = vpop.f32.mrf.mxu3  ;;  %881 = vmatpush.msra.mxu2 %v3931_v2  ;;  %818 = vmatpush.msra.mxu3 %v4145_v60 }
 0x235   :  { %882 = vmatpush.msra.mxu2 %v3953_v7  ;;  %819 = vmatpush.msra.mxu3 %v4151_v62 }
 0x236   :  { %3561 = vmatmul.msk.f32.vlgmr.msrb.gmra.mxu3 %vm94_vm1, %v4094_v51  ;;  %3564 = vmatmul.msk.f32.vlgmr.msrb.gmra.mxu2 %vm58_vm0, %v4221_v40  ;;  %v634_v51 = vmul.f32 %v395_v4, %v4186_v14  ;;  %v658_v14 = vrot.slane %v4317_v26, 7 }
 0x237   :  { %3567 = vmatmul.msk.f32.vlgmr.msrb.gmra.mxu1 %vm58_vm0, %v4265_v50  ;;  %883 = vmatpush.msra.mxu2 %v3970_v10 }
 0x238   :  { %900 = vmatpush.msrb.mxu3 %v4129_v58  ;;  %1006 = vmatpush.xpose.msra.mxu0 %v4035_v23  ;;  %v638_v41 = vsub.f32 1.0, %v634_v51 }
 0x239   :  { %945 = vmatpush.xpose.msra.mxu1 %v4004_v17  ;;  %964 = vmatpush.xpose.msrb.mxu2 %v3923_v61 }
 0x23a   :  { %901 = vmatpush.msrb.mxu3 %v4138_v59  ;;  %v642_v3 = vmul.f32 %v638_v41, %v4183_v11 }
 0x23b   :  { %v435_v33 = vpop.f32.mrf.mxu3 }
 0x23c   :  { %v636_v37 = vmul.f32 %v435_v33, %v4236_v46  ;;  %902 = vmatpush.msrb.mxu3 %v4145_v60  ;;  %1007 = vmatpush.xpose.msra.mxu0 %v4053_v29 }
 0x23d   :  { %946 = vmatpush.xpose.msra.mxu1 %v4019_v20  ;;  %965 = vmatpush.xpose.msrb.mxu2 %v3931_v2 }
 0x23e   :  { %3565 = vmatmul.msk.f32.vlgmr.msra.gmra.mxu3 %vm58_vm0, %v4221_v40  ;;  %3568 = vmatmul.msk.f32.vlgmr.msra.gmra.mxu2 %vm58_vm0, %v4265_v50  ;;  %v640_v47 = vsub.f32 1.0, %v636_v37  ;;  %v645_v40 = vmul.f32 %v641_v38, %v4177_v1  ;;  %v4324_v1 = vadd.f32 %v646_v63, %v642_v3 }
 0x23f   :  { %903 = vmatpush.msrb.mxu3 %v4151_v62 }
 0x240   :  { %1138 = vmatpush.msrb.mxu0 %v3948_v6  ;;  %v4315_v4 = vadd.f32 %v649_v43, %v645_v40  ;;  %v644_v31 = vmul.f32 %v640_v47, %v4194_v30  ;;  %v664_v51 = vsel %vm268_vm10, %v4324_v1, %v658_v14  ;;  %v1144_v40 = vrot.slane %v3981_v13, 2 }
 0x241   :  { %984 = vmatpush.xpose.msra.mxu3 %v4129_v58  ;;  %947 = vmatpush.xpose.msra.mxu1 %v4040_v25 }
 0x242   :  { %1139 = vmatpush.msrb.mxu0 %v3965_v9  ;;  %966 = vmatpush.xpose.msrb.mxu2 %v3953_v7  ;;  %v660_v35 = vrot.slane %v4315_v4, 5  ;;  %v4384_v3 = vsel %vm268_vm10, %v1145_v48, %v1144_v40 }
 0x243   :  { %v521_v28 = vpop.f32.mrf.mxu3 }
 0x244   :  { %v648_v32 = vmul.f32 %v521_v28, %v4236_v46  ;;  %v661_v46 = vsel %vm262_vm12, %v4324_v1, %v658_v14 }
 0x245   :  { %1078 = vmatpush.msrb.mxu1 %v3943_v5  ;;  %985 = vmatpush.xpose.msra.mxu3 %v4138_v59 }
 0x246   :  { %v4326_v11 = vadd.f32 %v648_v32, %v644_v31  ;;  %3569 = vmatmul.msk.f32.vlgmr.msrb.gmra.mxu3 %vm58_vm0, %v4265_v50  ;;  %967 = vmatpush.xpose.msrb.mxu2 %v3970_v10 }
 0x247   :  { %1079 = vmatpush.msrb.mxu1 %v3960_v8 }
 0x248   :  { %v659_v30 = vrot.slane %v4326_v11, 6 }
 0x249   :  { %986 = vmatpush.xpose.msra.mxu3 %v4145_v60 }
 0x24a   :  { %1098 = vmatpush.msra.mxu2 %v3994_v15  ;;  %v662_v50 = vsel %vm264_vm13, %v659_v30, %v660_v35  ;;  %v665_v33 = vsel %vm270_vm11, %v659_v30, %v660_v35  ;;  %v1229_v35 = vrot.slane %v4006_v18, 2  ;;  %v1230_v30 = vrot.slane %v4026_v22, 1 }
 0x24b   :  { %v663_v34 = vsel %vm266_vm15, %v661_v46, %v662_v50  ;;  %v666_v36 = vsel %vm272_vm14, %v664_v51, %v665_v33 }
 0x24c   :  { %1099 = vmatpush.msra.mxu2 %v4024_v21  ;;  %v667_v37 = vrot.slane %v666_v36, 1  ;;  %3557 = vst.msk [vmem:[%s5400_s15 + $0x1] ss:$8 sm:$0xf] %vm4244_vm2, %v663_v34  ;;  %v4403_v50 = vsel %vm268_vm10, %v1230_v30, %v1229_v35 }
 0x24d   :  { %987 = vmatpush.xpose.msra.mxu3 %v4151_v62 }
 0x24e   :  { %3558 = vst.msk [vmem:[%s5400_s15 + $0x41] ss:$8 sm:$0xf] %vm4244_vm2, %v667_v37 }
 0x251   :  { %1118 = vmatpush.msrb.mxu3 %v4081_v39 }
 0x253   :  { %1119 = vmatpush.msrb.mxu3 %v4089_v27 }
 0x295   :  { %v625_v38 = vpop.f32.mrf.mxu0 }
 0x29b   :  { %v565_v41 = vpop.f32.mrf.mxu1 }
 0x29d   :  { %v4358_v42 = vpop.f32.mrf.mxu0 }
 0x29e   :  { %v931_v43 = vmul.f32 %v4358_v42, %v4315_v4 }
 0x2a0   :  { %1008 = vmatmul.f32.vlgmr.msra.gmra.mxu0 %v931_v43 }
 0x2a1   :  { %1221 = vmatpush.msra.mxu0 %v3999_v16 }
 0x2a3   :  { %v4363_v44 = vpop.f32.mrf.mxu1  ;;  %1222 = vmatpush.msra.mxu0 %v4014_v19 }
 0x2a4   :  { %v928_v24 = vmul.f32 %v4363_v44, %v4324_v1 }
 0x2a5   :  { %1223 = vmatpush.msra.mxu0 %v4035_v23  ;;  %v841_v33 = vpop.f32.mrf.mxu0 }
 0x2a6   :  { %948 = vmatmul.f32.vlgmr.msra.gmra.mxu1 %v928_v24  ;;  %v1020_v43 = vmul.f32 %v841_v33, %v4358_v42 }
 0x2a7   :  { %1161 = vmatpush.msra.mxu1 %v3977_v12  ;;  %1224 = vmatpush.msra.mxu0 %v4053_v29 }
 0x2a8   :  { %3576 = vmatmul.msk.f32.vlgmr.msrb.gmra.mxu0 %vm94_vm1, %v4097_v52 }
 0x2a9   :  { %v585_v47 = vpop.f32.mrf.mxu2  ;;  %1162 = vmatpush.msra.mxu1 %v4004_v17  ;;  %1306 = vmatpush.msrb.mxu0 %v3999_v16 }
 0x2aa   :  { %v586_v63 = vadd.f32 %v585_v47, %v565_v41 }
 0x2ab   :  { %1163 = vmatpush.msra.mxu1 %v4019_v20  ;;  %1307 = vmatpush.msrb.mxu0 %v4014_v19 }
 0x2ad   :  { %1164 = vmatpush.msra.mxu1 %v4040_v25  ;;  %1308 = vmatpush.msrb.mxu0 %v4035_v23 }
 0x2ae   :  { %3573 = vmatmul.msk.f32.vlgmr.msrb.gmra.mxu1 %vm94_vm1, %v4097_v52 }
 0x2af   :  { %1246 = vmatpush.msrb.mxu1 %v3977_v12  ;;  %1309 = vmatpush.msrb.mxu0 %v4053_v29 }
 0x2b0   :  { %3580 = vmatmul.msk.f32.vlgmr.msra.gmra.mxu0 %vm58_vm0, %v4384_v3 }
 0x2b1   :  { %v605_v28 = vpop.f32.mrf.mxu3  ;;  %v717_v31 = vpop.f32.mrf.mxu2  ;;  %1247 = vmatpush.msrb.mxu1 %v4004_v17  ;;  %1390 = vmatpush.xpose.msra.mxu0 %v3999_v16 }
 0x2b2   :  { %v606_v32 = vadd.f32 %v605_v28, %v586_v63  ;;  %v929_v14 = vmul.f32 %v717_v31, %v4317_v26  ;;  %v925_v63 = vpop.f32.mrf.mxu0  ;;  %v1024_v28 = vsub.f32 1.0, %v1020_v43 }
 0x2b3   :  { %1248 = vmatpush.msrb.mxu1 %v4019_v20  ;;  %v1032_v35 = vmul.f32 %v925_v63, %v4358_v42 }
 0x2b4   :  { %v626_v46 = vadd.f32 %v625_v38, %v606_v32  ;;  %968 = vmatmul.f32.vlgmr.msrb.gmra.mxu2 %v929_v14  ;;  %v781_v38 = vpop.f32.mrf.mxu1 }
 0x2b5   :  { %1181 = vmatpush.msrb.mxu2 %v3923_v61  ;;  %1249 = vmatpush.msrb.mxu1 %v4040_v25  ;;  %v1017_v32 = vmul.f32 %v781_v38, %v4363_v44 }
 0x2b6   :  { %v629_v51 = vrot.slane %v626_v46, 1  ;;  %632 = vst.msk [vmem:[#allocation2] sm:$0x1] %vm631_vm3, %v626_v46  ;;  %3577 = vmatmul.msk.f32.vlgmr.msra.gmra.mxu1 %vm58_vm0, %v4384_v3  ;;  %1391 = vmatpush.xpose.msra.mxu0 %v4014_v19 }
 0x2b7   :  { %1182 = vmatpush.msrb.mxu2 %v3931_v2  ;;  %1330 = vmatpush.xpose.msra.mxu1 %v3977_v12 }
 0x2b8   :  { %633 = vst.msk [vmem:[#allocation2 + $0x8] sm:$0x1] %vm631_vm3, %v629_v51  ;;  %3584 = vmatmul.msk.f32.vlgmr.msrb.gmra.mxu0 %vm58_vm0, %v4403_v50  ;;  %v1021_v51 = vsub.f32 1.0, %v1017_v32 }
 0x2b9   :  { %v737_v34 = vpop.f32.mrf.mxu3  ;;  %v801_v36 = vpop.f32.mrf.mxu2  ;;  %1183 = vmatpush.msrb.mxu2 %v3953_v7 }
 0x2ba   :  { %v930_v37 = vmul.f32 %v737_v34, %v4326_v11  ;;  %1392 = vmatpush.xpose.msra.mxu0 %v4035_v23  ;;  %v1018_v41 = vmul.f32 %v801_v36, %v717_v31 }
 0x2bb   :  { %1184 = vmatpush.msrb.mxu2 %v3970_v10  ;;  %1331 = vmatpush.xpose.msra.mxu1 %v4004_v17 }
 0x2bc   :  { %988 = vmatmul.f32.vlgmr.msra.gmra.mxu3 %v930_v37  ;;  %3574 = vmatmul.msk.f32.vlgmr.msra.gmra.mxu2 %vm94_vm1, %v4097_v52  ;;  %v1022_v40 = vsub.f32 1.0, %v1018_v41 }
 0x2bd   :  { %1201 = vmatpush.msra.mxu3 %v4129_v58  ;;  %1266 = vmatpush.msra.mxu2 %v3923_v61 }
 0x2be   :  { %3581 = vmatmul.msk.f32.vlgmr.msrb.gmra.mxu1 %vm58_vm0, %v4403_v50  ;;  %1393 = vmatpush.xpose.msra.mxu0 %v4053_v29  ;;  %v1026_v30 = vmul.f32 %v1022_v40, %v4317_v26 }
 0x2bf   :  { %1202 = vmatpush.msra.mxu3 %v4138_v59  ;;  %1267 = vmatpush.msra.mxu2 %v3931_v2 }
 0x2c0   :  { %1332 = vmatpush.xpose.msra.mxu1 %v4019_v20 }
 0x2c1   :  { %v821_v24 = vpop.f32.mrf.mxu3  ;;  %v885_v47 = vpop.f32.mrf.mxu2  ;;  %1203 = vmatpush.msra.mxu3 %v4145_v60  ;;  %1268 = vmatpush.msra.mxu2 %v3953_v7 }
 0x2c2   :  { %1524 = vmatpush.msrb.mxu0 %v3948_v6  ;;  %v1019_v48 = vmul.f32 %v821_v24, %v737_v34  ;;  %v1030_v14 = vmul.f32 %v885_v47, %v717_v31  ;;  %v865_v31 = vpop.f32.mrf.mxu1 }
 0x2c3   :  { %1204 = vmatpush.msra.mxu3 %v4151_v62  ;;  %1269 = vmatpush.msra.mxu2 %v3970_v10  ;;  %v1029_v26 = vmul.f32 %v865_v31, %v4363_v44 }
 0x2c4   :  { %1525 = vmatpush.msrb.mxu0 %v3965_v9  ;;  %3575 = vmatmul.msk.f32.vlgmr.msrb.gmra.mxu3 %vm94_vm1, %v4097_v52  ;;  %v1023_v46 = vsub.f32 1.0, %v1019_v48  ;;  %v1028_v52 = vmul.f32 %v1024_v28, %v4315_v4  ;;  %v4445_v33 = vadd.f32 %v1030_v14, %v1026_v30  ;;  %v1025_v4 = vmul.f32 %v1021_v51, %v4324_v1 }
 0x2c5   :  { %3578 = vmatmul.msk.f32.vlgmr.msrb.gmra.mxu2 %vm58_vm0, %v4384_v3  ;;  %1286 = vmatpush.msrb.mxu3 %v4129_v58  ;;  %v1531_v30 = vrot.slane %v3926_v0, 2  ;;  %v1616_v51 = vrot.slane %v4026_v22, 2 }
 0x2c6   :  { %1333 = vmatpush.xpose.msra.mxu1 %v4040_v25  ;;  %1350 = vmatpush.xpose.msrb.mxu2 %v3923_v61  ;;  %v4449_v42 = vadd.f32 %v1032_v35, %v1028_v52  ;;  %v1027_v37 = vmul.f32 %v1023_v46, %v4326_v11  ;;  %v1041_v41 = vrot.slane %v4445_v33, 7  ;;  %v4465_v44 = vadd.f32 %v1029_v26, %v1025_v4 }
 0x2c7   :  { %1287 = vmatpush.msrb.mxu3 %v4138_v59  ;;  %v1530_v35 = vrot.slane %v3981_v13, 3  ;;  %v1615_v52 = vrot.slane %v4006_v18, 3 }
 0x2c8   :  { %v1043_v11 = vrot.slane %v4449_v42, 5  ;;  %v1044_v1 = vsel %vm262_vm12, %v4465_v44, %v1041_v41  ;;  %v1047_v24 = vsel %vm268_vm10, %v4465_v44, %v1041_v41 }
 0x2c9   :  { %v905_v36 = vpop.f32.mrf.mxu3  ;;  %1288 = vmatpush.msrb.mxu3 %v4145_v60  ;;  %v4523_v31 = vsel %vm268_vm10, %v1531_v30, %v1530_v35 }
 0x2ca   :  { %1464 = vmatpush.msrb.mxu1 %v3943_v5  ;;  %v1031_v38 = vmul.f32 %v905_v36, %v737_v34  ;;  %1351 = vmatpush.xpose.msrb.mxu2 %v3931_v2 }
 0x2cb   :  { %1289 = vmatpush.msrb.mxu3 %v4151_v62 }
 0x2cc   :  { %1465 = vmatpush.msrb.mxu1 %v3960_v8  ;;  %v4457_v43 = vadd.f32 %v1031_v38, %v1027_v37  ;;  %3579 = vmatmul.msk.f32.vlgmr.msra.gmra.mxu3 %vm58_vm0, %v4384_v3  ;;  %v4539_v38 = vsel %vm268_vm10, %v1616_v51, %v1615_v52 }
 0x2cd   :  { %3582 = vmatmul.msk.f32.vlgmr.msra.gmra.mxu2 %vm58_vm0, %v4403_v50  ;;  %1370 = vmatpush.xpose.msra.mxu3 %v4129_v58 }
 0x2ce   :  { %v1042_v34 = vrot.slane %v4457_v43, 6  ;;  %1352 = vmatpush.xpose.msrb.mxu2 %v3953_v7 }
 0x2d0   :  { %v1045_v3 = vsel %vm264_vm13, %v1042_v34, %v1043_v11  ;;  %v1048_v47 = vsel %vm270_vm11, %v1042_v34, %v1043_v11 }
 0x2d1   :  { %v1046_v40 = vsel %vm266_vm15, %v1044_v1, %v1045_v3  ;;  %v1049_v48 = vsel %vm272_vm14, %v1047_v24, %v1048_v47  ;;  %1371 = vmatpush.xpose.msra.mxu3 %v4138_v59 }
 0x2d2   :  { %v1050_v63 = vrot.slane %v1049_v48, 1  ;;  %1353 = vmatpush.xpose.msrb.mxu2 %v3970_v10  ;;  %3571 = vst.msk [vmem:[%s5400_s15 + $0x2] ss:$8 sm:$0xf] %vm4244_vm2, %v1046_v40 }
 0x2d4   :  { %3583 = vmatmul.msk.f32.vlgmr.msrb.gmra.mxu3 %vm58_vm0, %v4403_v50  ;;  %3572 = vst.msk [vmem:[%s5400_s15 + $0x42] ss:$8 sm:$0xf] %vm4244_vm2, %v1050_v63 }
 0x2d5   :  { %1372 = vmatpush.xpose.msra.mxu3 %v4145_v60 }
 0x2d6   :  { %1484 = vmatpush.msra.mxu2 %v3994_v15 }
 0x2d8   :  { %1485 = vmatpush.msra.mxu2 %v4024_v21 }
 0x2d9   :  { %1373 = vmatpush.xpose.msra.mxu3 %v4151_v62 }
 0x2dd   :  { %1504 = vmatpush.msrb.mxu3 %v4081_v39 }
 0x2df   :  { %1505 = vmatpush.msrb.mxu3 %v4089_v27 }
 0x31d   :  { %v1009_v15 = vpop.f32.mrf.mxu0 }
 0x323   :  { %v949_v28 = vpop.f32.mrf.mxu1 }
 0x325   :  { %v4497_v32 = vpop.f32.mrf.mxu0 }
 0x326   :  { %v1317_v50 = vmul.f32 %v4497_v32, %v4449_v42 }
 0x328   :  { %1394 = vmatmul.f32.vlgmr.msra.gmra.mxu0 %v1317_v50 }
 0x329   :  { %1607 = vmatpush.msra.mxu0 %v3999_v16 }
 0x32b   :  { %v4502_v14 = vpop.f32.mrf.mxu1  ;;  %1608 = vmatpush.msra.mxu0 %v4014_v19 }
 0x32c   :  { %v1314_v21 = vmul.f32 %v4502_v14, %v4465_v44 }
 0x32d   :  { %1609 = vmatpush.msra.mxu0 %v4035_v23 }
 0x32e   :  { %1334 = vmatmul.f32.vlgmr.msra.gmra.mxu1 %v1314_v21 }
 0x32f   :  { %1547 = vmatpush.msra.mxu1 %v3977_v12  ;;  %1610 = vmatpush.msra.mxu0 %v4053_v29 }
 0x330   :  { %3590 = vmatmul.msk.f32.vlgmr.msrb.gmra.mxu0 %vm94_vm1, %v4100_v53 }
 0x331   :  { %1548 = vmatpush.msra.mxu1 %v4004_v17  ;;  %1692 = vmatpush.msrb.mxu0 %v3999_v16 }
 0x333   :  { %1549 = vmatpush.msra.mxu1 %v4019_v20  ;;  %1693 = vmatpush.msrb.mxu0 %v4014_v19 }
 0x335   :  { %1550 = vmatpush.msra.mxu1 %v4040_v25  ;;  %1694 = vmatpush.msrb.mxu0 %v4035_v23 }
 0x336   :  { %3587 = vmatmul.msk.f32.vlgmr.msrb.gmra.mxu1 %vm94_vm1, %v4100_v53 }
 0x337   :  { %v969_v46 = vpop.f32.mrf.mxu2  ;;  %1632 = vmatpush.msrb.mxu1 %v3977_v12  ;;  %1695 = vmatpush.msrb.mxu0 %v4053_v29 }
 0x338   :  { %3594 = vmatmul.msk.f32.vlgmr.msra.gmra.mxu0 %vm58_vm0, %v4523_v31  ;;  %v970_v36 = vadd.f32 %v969_v46, %v949_v28 }
 0x339   :  { %1633 = vmatpush.msrb.mxu1 %v4004_v17  ;;  %1776 = vmatpush.xpose.msra.mxu0 %v3999_v16 }
 0x33b   :  { %1634 = vmatpush.msrb.mxu1 %v4019_v20 }
 0x33d   :  { %1635 = vmatpush.msrb.mxu1 %v4040_v25  ;;  %1777 = vmatpush.xpose.msra.mxu0 %v4014_v19 }
 0x33e   :  { %3591 = vmatmul.msk.f32.vlgmr.msra.gmra.mxu1 %vm58_vm0, %v4523_v31 }
 0x33f   :  { %v989_v26 = vpop.f32.mrf.mxu3  ;;  %v1101_v37 = vpop.f32.mrf.mxu2  ;;  %1716 = vmatpush.xpose.msra.mxu1 %v3977_v12 }
 0x340   :  { %v990_v16 = vadd.f32 %v989_v26, %v970_v36  ;;  %v1315_v4 = vmul.f32 %v1101_v37, %v4445_v33  ;;  %3598 = vmatmul.msk.f32.vlgmr.msrb.gmra.mxu0 %vm58_vm0, %v4539_v38  ;;  %v1226_v12 = vpop.f32.mrf.mxu0  ;;  %v4634_v26 = vld [vmem:[%s5390_s5 + $0x8] sm:$0xff] }
 0x341   :  { %1778 = vmatpush.xpose.msra.mxu0 %v4035_v23 }
 0x342   :  { %v1010_v19 = vadd.f32 %v1009_v15, %v990_v16  ;;  %1354 = vmatmul.f32.vlgmr.msrb.gmra.mxu2 %v1315_v4  ;;  %v4596_v15 = vld [vmem:[%s5390_s5 + $0x48] sm:$0xff] }
 0x343   :  { %1567 = vmatpush.msrb.mxu2 %v3923_v61  ;;  %1717 = vmatpush.xpose.msra.mxu1 %v4004_v17  ;;  %v4641_v16 = vld [vmem:[%s5389_s4 + $0x28] sm:$0xff] }
 0x344   :  { %v1013_v41 = vrot.slane %v1010_v19, 1  ;;  %1015 = vst.msk [vmem:[#allocation2 + $0x1] sm:$0x1] %vm631_vm3, %v1010_v19 }
 0x345   :  { %1568 = vmatpush.msrb.mxu2 %v3931_v2  ;;  %1779 = vmatpush.xpose.msra.mxu0 %v4053_v29  ;;  %v1166_v29 = vpop.f32.mrf.mxu1 }
 0x346   :  { %1016 = vst.msk [vmem:[#allocation2 + $0x9] sm:$0x1] %vm631_vm3, %v1013_v41  ;;  %3595 = vmatmul.msk.f32.vlgmr.msrb.gmra.mxu1 %vm58_vm0, %v4539_v38 }
 0x347   :  { %v1121_v23 = vpop.f32.mrf.mxu3  ;;  %1569 = vmatpush.msrb.mxu2 %v3953_v7  ;;  %1718 = vmatpush.xpose.msra.mxu1 %v4019_v20 }
 0x348   :  { %v1186_v11 = vpop.f32.mrf.mxu2  ;;  %v1316_v17 = vmul.f32 %v1121_v23, %v4457_v43 }
 0x349   :  { %1910 = vmatpush.msrb.mxu0 %v3948_v6  ;;  %1570 = vmatpush.msrb.mxu2 %v3970_v10  ;;  %v1404_v6 = vmul.f32 %v1186_v11, %v1101_v37  ;;  %v4701_v11 = vld [vmem:[%s5390_s5 + $0x18] sm:$0xff] }
 0x34a   :  { %1374 = vmatmul.f32.vlgmr.msra.gmra.mxu3 %v1316_v17  ;;  %3588 = vmatmul.msk.f32.vlgmr.msra.gmra.mxu2 %vm94_vm1, %v4100_v53  ;;  %v4709_v17 = vld [vmem:[%s5390_s5 + $0x40] sm:$0xff] }
 0x34b   :  { %1911 = vmatpush.msrb.mxu0 %v3965_v9  ;;  %1587 = vmatpush.msra.mxu3 %v4129_v58  ;;  %v1406_v9 = vmul.f32 %v1226_v12, %v4497_v32  ;;  %v1408_v1 = vsub.f32 1.0, %v1404_v6  ;;  %v4673_v12 = vld [vmem:[%s5390_s5 + $0x78] sm:$0xff]  ;;  %v1917_v6 = vrot.slane %v3926_v0, 3 }
 0x34c   :  { %1652 = vmatpush.msra.mxu2 %v3923_v61  ;;  %1719 = vmatpush.xpose.msra.mxu1 %v4040_v25  ;;  %v1311_v61 = vpop.f32.mrf.mxu0  ;;  %v1403_v25 = vmul.f32 %v1166_v29, %v4502_v14  ;;  %v1916_v29 = vrot.slane %v3981_v13, 4 }
 0x34d   :  { %1588 = vmatpush.msra.mxu3 %v4138_v59  ;;  %v1251_v47 = vpop.f32.mrf.mxu1 }
 0x34e   :  { %1653 = vmatpush.msra.mxu2 %v3931_v2  ;;  %v1410_v2 = vsub.f32 1.0, %v1406_v9  ;;  %v1407_v40 = vsub.f32 1.0, %v1403_v25  ;;  %v1415_v28 = vmul.f32 %v1251_v47, %v4502_v14  ;;  %v4615_v14 = vld [vmem:[%s5390_s5 + $0x28] sm:$0xff]  ;;  %v4718_v9 = vld [vmem:[%s5390_s5 + $0x20] sm:$0xff]  ;;  %v4762_v47 = vld [vmem:[%s5389_s4 + $0x38] sm:$0xff] }
 0x34f   :  { %v1206_v20 = vpop.f32.mrf.mxu3  ;;  %1589 = vmatpush.msra.mxu3 %v4145_v60 }
 0x350   :  { %1850 = vmatpush.msrb.mxu1 %v3943_v5  ;;  %v1271_v34 = vpop.f32.mrf.mxu2  ;;  %1654 = vmatpush.msra.mxu2 %v3953_v7  ;;  %v1405_v24 = vmul.f32 %v1206_v20, %v1121_v23  ;;  %v4583_v5 = vld [vmem:[%s5390_s5 + $0x68] sm:$0xff]  ;;  %v1418_v7 = vmul.f32 %v1311_v61, %v4497_v32  ;;  %v1411_v50 = vmul.f32 %v1407_v40, %v4465_v44  ;;  %v4725_v20 = vld [vmem:[%s5390_s5] sm:$0xff]  ;;  %v4769_v40 = vld [vmem:[%s5389_s4 + $0x18] sm:$0xff] }
 0x351   :  { %1590 = vmatpush.msra.mxu3 %v4151_v62  ;;  %v1416_v3 = vmul.f32 %v1271_v34, %v1101_v37  ;;  %v4732_v34 = vsel %vm268_vm10, %v1917_v6, %v1916_v29 }
 0x352   :  { %1851 = vmatpush.msrb.mxu1 %v3960_v8  ;;  %1655 = vmatpush.msra.mxu2 %v3970_v10  ;;  %v1412_v8 = vmul.f32 %v1408_v1, %v4445_v33  ;;  %v1409_v10 = vsub.f32 1.0, %v1405_v24  ;;  %v4620_v44 = vadd.f32 %v1415_v28, %v1411_v50  ;;  %v2001_v1 = vrot.slane %v4006_v18, 4 }
 0x353   :  { %3589 = vmatmul.msk.f32.vlgmr.msrb.gmra.mxu3 %vm94_vm1, %v4100_v53  ;;  %3592 = vmatmul.msk.f32.vlgmr.msrb.gmra.mxu2 %vm58_vm0, %v4523_v31  ;;  %v1414_v53 = vmul.f32 %v1410_v2, %v4449_v42  ;;  %v2002_v24 = vrot.slane %v4026_v22, 3 }
 0x354   :  { %1672 = vmatpush.msrb.mxu3 %v4129_v58  ;;  %1736 = vmatpush.xpose.msrb.mxu2 %v4583_v5  ;;  %v4590_v48 = vadd.f32 %v1416_v3, %v1412_v8  ;;  %v1413_v32 = vmul.f32 %v1409_v10, %v4457_v43 }
 0x355   :  { %v4599_v33 = vadd.f32 %v1418_v7, %v1414_v53  ;;  %v4748_v2 = vsel %vm268_vm10, %v2002_v24, %v2001_v1 }
 0x356   :  { %1673 = vmatpush.msrb.mxu3 %v4138_v59  ;;  %v1427_v21 = vrot.slane %v4590_v48, 7 }
 0x357   :  { %v1291_v63 = vpop.f32.mrf.mxu3  ;;  %v1429_v43 = vrot.slane %v4599_v33, 5 }
 0x358   :  { %1674 = vmatpush.msrb.mxu3 %v4145_v60  ;;  %1737 = vmatpush.xpose.msrb.mxu2 %v4596_v15  ;;  %v1417_v42 = vmul.f32 %v1291_v63, %v1121_v23  ;;  %v1430_v46 = vsel %vm262_vm12, %v4620_v44, %v1427_v21  ;;  %v4695_v23 = vld [vmem:[%s5390_s5 + $0x60] sm:$0xff] }
 0x35a   :  { %1675 = vmatpush.msrb.mxu3 %v4151_v62  ;;  %v4606_v35 = vadd.f32 %v1417_v42, %v1413_v32  ;;  %v4780_v32 = vld [vmem:[%s5389_s4 + $0x20] sm:$0xff] }
 0x35b   :  { %3593 = vmatmul.msk.f32.vlgmr.msra.gmra.mxu3 %vm58_vm0, %v4523_v31  ;;  %3596 = vmatmul.msk.f32.vlgmr.msra.gmra.mxu2 %vm58_vm0, %v4539_v38  ;;  %v1433_v31 = vsel %vm268_vm10, %v4620_v44, %v1427_v21 }
 0x35c   :  { %1738 = vmatpush.xpose.msrb.mxu2 %v4615_v14  ;;  %1756 = vmatpush.xpose.msra.mxu3 %v4129_v58  ;;  %v1428_v30 = vrot.slane %v4606_v35, 6 }
 0x35e   :  { %v1431_v52 = vsel %vm264_vm13, %v1428_v30, %v1429_v43  ;;  %v1434_v51 = vsel %vm270_vm11, %v1428_v30, %v1429_v43  ;;  %v4788_v43 = vld [vmem:[%s5389_s4] sm:$0xff] }
 0x35f   :  { %v1432_v36 = vsel %vm266_vm15, %v1430_v46, %v1431_v52  ;;  %v1435_v58 = vsel %vm272_vm14, %v1433_v31, %v1434_v51  ;;  %v4797_v46 = vld [vmem:[%s5390_s5 + $0x70] sm:$0xff] }
 0x360   :  { %1739 = vmatpush.xpose.msrb.mxu2 %v4634_v26  ;;  %1757 = vmatpush.xpose.msra.mxu3 %v4138_v59  ;;  %v1436_v37 = vrot.slane %v1435_v58, 1  ;;  %3585 = vst.msk [vmem:[%s5400_s15 + $0x3] ss:$8 sm:$0xf] %vm4244_vm2, %v1432_v36  ;;  %v4654_v59 = vld [vmem:[%s5389_s4 + $0x8] sm:$0xff]  ;;  %v4804_v52 = vld [vmem:[%s5390_s5 + $0x50] sm:$0xff] }
 0x362   :  { %3586 = vst.msk [vmem:[%s5400_s15 + $0x43] ss:$8 sm:$0xf] %vm4244_vm2, %v1436_v37  ;;  %v4812_v37 = vld [vmem:[%s5390_s5 + $0x30] sm:$0xff] }
 0x363   :  { %3597 = vmatmul.msk.f32.vlgmr.msrb.gmra.mxu3 %vm58_vm0, %v4539_v38 }
 0x364   :  { %1870 = vmatpush.msra.mxu2 %v4641_v16  ;;  %1758 = vmatpush.xpose.msra.mxu3 %v4145_v60 }
 0x366   :  { %1871 = vmatpush.msra.mxu2 %v4654_v59 }
 0x368   :  { %1759 = vmatpush.xpose.msra.mxu3 %v4151_v62  ;;  %v4689_v62 = vld [vmem:[%s5390_s5 + $0x38] sm:$0xff] }
 0x36c   :  { %1890 = vmatpush.msrb.mxu3 %v4081_v39  ;;  %v4681_v39 = vld [vmem:[%s5390_s5 + $0x58] sm:$0xff] }
 0x36e   :  { %1891 = vmatpush.msrb.mxu3 %v4089_v27 }
 0x3a5   :  { %v1395_v38 = vpop.f32.mrf.mxu0 }
 0x3ab   :  { %v1335_v4 = vpop.f32.mrf.mxu1 }
 0x3ad   :  { %v4666_v19 = vpop.f32.mrf.mxu0 }
 0x3ae   :  { %v1703_v41 = vmul.f32 %v4666_v19, %v4599_v33 }
 0x3b0   :  { %1780 = vmatmul.f32.vlgmr.msra.gmra.mxu0 %v1703_v41 }
 0x3b1   :  { %1993 = vmatpush.msra.mxu0 %v4673_v12 }
 0x3b3   :  { %v4676_v60 = vpop.f32.mrf.mxu1  ;;  %1994 = vmatpush.msra.mxu0 %v4681_v39 }
 0x3b4   :  { %v1700_v27 = vmul.f32 %v4676_v60, %v4620_v44 }
 0x3b5   :  { %1995 = vmatpush.msra.mxu0 %v4689_v62  ;;  %v1612_v28 = vpop.f32.mrf.mxu0 }
 0x3b6   :  { %1720 = vmatmul.f32.vlgmr.msra.gmra.mxu1 %v1700_v27  ;;  %v1792_v51 = vmul.f32 %v1612_v28, %v4666_v19  ;;  %v4819_v27 = vld [vmem:[%s5390_s5 + $0x10] sm:$0xff] }
 0x3b7   :  { %1933 = vmatpush.msra.mxu1 %v4695_v23  ;;  %1996 = vmatpush.msra.mxu0 %v4701_v11 }
 0x3b8   :  { %3604 = vmatmul.msk.f32.vlgmr.msrb.gmra.mxu0 %vm94_vm1, %v4103_v54  ;;  %v1796_v29 = vsub.f32 1.0, %v1792_v51 }
 0x3b9   :  { %1934 = vmatpush.msra.mxu1 %v4709_v17  ;;  %2078 = vmatpush.msrb.mxu0 %v4673_v12 }
 0x3bb   :  { %1935 = vmatpush.msra.mxu1 %v4718_v9  ;;  %2079 = vmatpush.msrb.mxu0 %v4681_v39  ;;  %v1552_v30 = vpop.f32.mrf.mxu1 }
 0x3bc   :  { %v1789_v6 = vmul.f32 %v1552_v30, %v4676_v60 }
 0x3bd   :  { %1936 = vmatpush.msra.mxu1 %v4725_v20  ;;  %2080 = vmatpush.msrb.mxu0 %v4689_v62  ;;  %v1697_v41 = vpop.f32.mrf.mxu0 }
 0x3be   :  { %3601 = vmatmul.msk.f32.vlgmr.msrb.gmra.mxu1 %vm94_vm1, %v4103_v54  ;;  %v1804_v24 = vmul.f32 %v1697_v41, %v4666_v19 }
 0x3bf   :  { %2018 = vmatpush.msrb.mxu1 %v4695_v23  ;;  %2081 = vmatpush.msrb.mxu0 %v4701_v11 }
 0x3c0   :  { %3608 = vmatmul.msk.f32.vlgmr.msra.gmra.mxu0 %vm58_vm0, %v4732_v34 }
 0x3c1   :  { %2019 = vmatpush.msrb.mxu1 %v4709_v17  ;;  %2162 = vmatpush.xpose.msra.mxu0 %v4673_v12 }
 0x3c3   :  { %2020 = vmatpush.msrb.mxu1 %v4718_v9 }
 0x3c5   :  { %v1355_v61 = vpop.f32.mrf.mxu2  ;;  %2021 = vmatpush.msrb.mxu1 %v4725_v20  ;;  %2163 = vmatpush.xpose.msra.mxu0 %v4681_v39 }
 0x3c6   :  { %3605 = vmatmul.msk.f32.vlgmr.msra.gmra.mxu1 %vm58_vm0, %v4732_v34  ;;  %v1356_v25 = vadd.f32 %v1355_v61, %v1335_v4 }
 0x3c7   :  { %2102 = vmatpush.xpose.msra.mxu1 %v4695_v23 }
 0x3c8   :  { %3612 = vmatmul.msk.f32.vlgmr.msrb.gmra.mxu0 %vm58_vm0, %v4748_v2 }
 0x3c9   :  { %2164 = vmatpush.xpose.msra.mxu0 %v4689_v62 }
 0x3cb   :  { %2103 = vmatpush.xpose.msra.mxu1 %v4709_v17 }
 0x3cd   :  { %v1375_v3 = vpop.f32.mrf.mxu3  ;;  %v1487_v7 = vpop.f32.mrf.mxu2  ;;  %2165 = vmatpush.xpose.msra.mxu0 %v4701_v11 }
 0x3ce   :  { %v1376_v8 = vadd.f32 %v1375_v3, %v1356_v25  ;;  %v1701_v10 = vmul.f32 %v1487_v7, %v4590_v48  ;;  %3609 = vmatmul.msk.f32.vlgmr.msrb.gmra.mxu1 %vm58_vm0, %v4748_v2  ;;  %v1637_v3 = vpop.f32.mrf.mxu1 }
 0x3cf   :  { %2104 = vmatpush.xpose.msra.mxu1 %v4718_v9  ;;  %v1801_v19 = vmul.f32 %v1637_v3, %v4676_v60  ;;  %v2387_v3 = vrot.slane %v4006_v18, 5 }
 0x3d0   :  { %v1396_v53 = vadd.f32 %v1395_v38, %v1376_v8  ;;  %1740 = vmatmul.f32.vlgmr.msrb.gmra.mxu2 %v1701_v10  ;;  %v1793_v8 = vsub.f32 1.0, %v1789_v6 }
 0x3d1   :  { %2296 = vmatpush.msrb.mxu0 %v4762_v47  ;;  %1953 = vmatpush.msrb.mxu2 %v4583_v5 }
 0x3d2   :  { %v1399_v63 = vrot.slane %v1396_v53, 1  ;;  %1401 = vst.msk [vmem:[#allocation2 + $0x2] sm:$0x1] %vm631_vm3, %v1396_v53  ;;  %v1797_v28 = vmul.f32 %v1793_v8, %v4620_v44 }
 0x3d3   :  { %2297 = vmatpush.msrb.mxu0 %v4769_v40  ;;  %1954 = vmatpush.msrb.mxu2 %v4596_v15 }
 0x3d4   :  { %2105 = vmatpush.xpose.msra.mxu1 %v4725_v20  ;;  %1402 = vst.msk [vmem:[#allocation2 + $0xa] sm:$0x1] %vm631_vm3, %v1399_v63  ;;  %v4854_v60 = vadd.f32 %v1801_v19, %v1797_v28 }
 0x3d5   :  { %1955 = vmatpush.msrb.mxu2 %v4615_v14 }
 0x3d6   :  { %v1507_v42 = vpop.f32.mrf.mxu3  ;;  %v1572_v50 = vpop.f32.mrf.mxu2 }
 0x3d7   :  { %v1702_v21 = vmul.f32 %v1507_v42, %v4606_v35  ;;  %1956 = vmatpush.msrb.mxu2 %v4634_v26  ;;  %v1790_v31 = vmul.f32 %v1572_v50, %v1487_v7 }
 0x3d8   :  { %2236 = vmatpush.msrb.mxu1 %v4780_v32  ;;  %3602 = vmatmul.msk.f32.vlgmr.msra.gmra.mxu2 %vm94_vm1, %v4103_v54 }
 0x3d9   :  { %1760 = vmatmul.f32.vlgmr.msra.gmra.mxu3 %v1702_v21  ;;  %2038 = vmatpush.msra.mxu2 %v4583_v5  ;;  %v1794_v38 = vsub.f32 1.0, %v1790_v31 }
 0x3da   :  { %2237 = vmatpush.msrb.mxu1 %v4788_v43  ;;  %1973 = vmatpush.msra.mxu3 %v4797_v46 }
 0x3db   :  { %2039 = vmatpush.msra.mxu2 %v4596_v15  ;;  %v1798_v61 = vmul.f32 %v1794_v38, %v4590_v48 }
 0x3dc   :  { %1974 = vmatpush.msra.mxu3 %v4804_v52 }
 0x3dd   :  { %2040 = vmatpush.msra.mxu2 %v4615_v14 }
 0x3de   :  { %v1592_v36 = vpop.f32.mrf.mxu3  ;;  %v1657_v58 = vpop.f32.mrf.mxu2  ;;  %1975 = vmatpush.msra.mxu3 %v4812_v37 }
 0x3df   :  { %v1791_v4 = vmul.f32 %v1592_v36, %v1507_v42  ;;  %2041 = vmatpush.msra.mxu2 %v4634_v26  ;;  %v1802_v1 = vmul.f32 %v1657_v58, %v1487_v7  ;;  %v1800_v7 = vmul.f32 %v1796_v29, %v4599_v33  ;;  %v4886_v58 = vld [vmem:[%s5389_s4 + $0x30] sm:$0xff] }
 0x3e0   :  { %1976 = vmatpush.msra.mxu3 %v4819_v27  ;;  %3606 = vmatmul.msk.f32.vlgmr.msrb.gmra.mxu2 %vm58_vm0, %v4732_v34 }
 0x3e1   :  { %3603 = vmatmul.msk.f32.vlgmr.msrb.gmra.mxu3 %vm94_vm1, %v4103_v54  ;;  %2122 = vmatpush.xpose.msrb.mxu2 %v4583_v5  ;;  %v1795_v25 = vsub.f32 1.0, %v1791_v4  ;;  %v4834_v10 = vadd.f32 %v1802_v1, %v1798_v61  ;;  %v4838_v53 = vadd.f32 %v1804_v24, %v1800_v7  ;;  %v2302_v24 = vrot.slane %v3981_v13, 5 }
 0x3e2   :  { %2058 = vmatpush.msrb.mxu3 %v4797_v46  ;;  %v2303_v61 = vrot.slane %v3926_v0, 4  ;;  %v2388_v7 = vrot.slane %v4026_v22, 4 }
 0x3e3   :  { %v1799_v48 = vmul.f32 %v1795_v25, %v4606_v35  ;;  %v1813_v33 = vrot.slane %v4834_v10, 7  ;;  %v1815_v35 = vrot.slane %v4838_v53, 5 }
 0x3e4   :  { %2059 = vmatpush.msrb.mxu3 %v4804_v52  ;;  %v4921_v25 = vsel %vm268_vm10, %v2303_v61, %v2302_v24  ;;  %v4937_v8 = vsel %vm268_vm10, %v2388_v7, %v2387_v3 }
 0x3e5   :  { %2123 = vmatpush.xpose.msrb.mxu2 %v4596_v15  ;;  %v1819_v21 = vsel %vm268_vm10, %v4854_v60, %v1813_v33 }
 0x3e6   :  { %v1677_v54 = vpop.f32.mrf.mxu3  ;;  %2060 = vmatpush.msrb.mxu3 %v4812_v37 }
 0x3e7   :  { %v1803_v63 = vmul.f32 %v1677_v54, %v1507_v42  ;;  %v1816_v42 = vsel %vm262_vm12, %v4854_v60, %v1813_v33 }
 0x3e8   :  { %2061 = vmatpush.msrb.mxu3 %v4819_v27  ;;  %3610 = vmatmul.msk.f32.vlgmr.msra.gmra.mxu2 %vm58_vm0, %v4748_v2 }
 0x3e9   :  { %v4845_v50 = vadd.f32 %v1803_v63, %v1799_v48  ;;  %3607 = vmatmul.msk.f32.vlgmr.msra.gmra.mxu3 %vm58_vm0, %v4732_v34  ;;  %2124 = vmatpush.xpose.msrb.mxu2 %v4615_v14 }
 0x3ea   :  { %2142 = vmatpush.xpose.msra.mxu3 %v4797_v46 }
 0x3eb   :  { %v1814_v44 = vrot.slane %v4845_v50, 6 }
 0x3ed   :  { %v1817_v34 = vsel %vm264_vm13, %v1814_v44, %v1815_v35  ;;  %v1820_v30 = vsel %vm270_vm11, %v1814_v44, %v1815_v35  ;;  %2125 = vmatpush.xpose.msrb.mxu2 %v4634_v26 }
 0x3ee   :  { %v1818_v31 = vsel %vm266_vm15, %v1816_v42, %v1817_v34  ;;  %v1821_v51 = vsel %vm272_vm14, %v1819_v21, %v1820_v30  ;;  %2143 = vmatpush.xpose.msra.mxu3 %v4804_v52 }
 0x3ef   :  { %v1822_v36 = vrot.slane %v1821_v51, 1  ;;  %3599 = vst.msk [vmem:[%s5400_s15 + $0x4] ss:$8 sm:$0xf] %vm4244_vm2, %v1818_v31 }
 0x3f1   :  { %2256 = vmatpush.msra.mxu2 %v4641_v16  ;;  %3611 = vmatmul.msk.f32.vlgmr.msrb.gmra.mxu3 %vm58_vm0, %v4748_v2  ;;  %3600 = vst.msk [vmem:[%s5400_s15 + $0x44] ss:$8 sm:$0xf] %vm4244_vm2, %v1822_v36  ;;  %v4892_v2 = vld [vmem:[%s5389_s4 + $0x10] sm:$0xff] }
 0x3f2   :  { %2144 = vmatpush.xpose.msra.mxu3 %v4812_v37 }
 0x3f3   :  { %2257 = vmatpush.msra.mxu2 %v4654_v59 }
 0x3f6   :  { %2145 = vmatpush.xpose.msra.mxu3 %v4819_v27 }
 0x3fa   :  { %2276 = vmatpush.msrb.mxu3 %v4886_v58 }
 0x3fc   :  { %2277 = vmatpush.msrb.mxu3 %v4892_v2 }
 0x42d   :  { %v1781_v38 = vpop.f32.mrf.mxu0 }
 0x433   :  { %v1721_v4 = vpop.f32.mrf.mxu1 }
 0x435   :  { %v4895_v41 = vpop.f32.mrf.mxu0 }
 0x436   :  { %v2089_v29 = vmul.f32 %v4895_v41, %v4838_v53 }
 0x438   :  { %2166 = vmatmul.f32.vlgmr.msra.gmra.mxu0 %v2089_v29 }
 0x439   :  { %2379 = vmatpush.msra.mxu0 %v4673_v12 }
 0x43b   :  { %v4900_v6 = vpop.f32.mrf.mxu1  ;;  %2380 = vmatpush.msra.mxu0 %v4681_v39 }
 0x43c   :  { %v2086_v1 = vmul.f32 %v4900_v6, %v4854_v60 }
 0x43d   :  { %2381 = vmatpush.msra.mxu0 %v4689_v62  ;;  %v1998_v42 = vpop.f32.mrf.mxu0 }
 0x43e   :  { %2106 = vmatmul.f32.vlgmr.msra.gmra.mxu1 %v2086_v1  ;;  %v2178_v36 = vmul.f32 %v1998_v42, %v4895_v41 }
 0x43f   :  { %2319 = vmatpush.msra.mxu1 %v4695_v23  ;;  %2382 = vmatpush.msra.mxu0 %v4701_v11 }
 0x440   :  { %3618 = vmatmul.msk.f32.vlgmr.msrb.gmra.mxu0 %vm94_vm1, %v4106_v55  ;;  %v2182_v61 = vsub.f32 1.0, %v2178_v36 }
 0x441   :  { %2320 = vmatpush.msra.mxu1 %v4709_v17  ;;  %2464 = vmatpush.msrb.mxu0 %v4673_v12 }
 0x443   :  { %2321 = vmatpush.msra.mxu1 %v4718_v9  ;;  %2465 = vmatpush.msrb.mxu0 %v4681_v39  ;;  %v1938_v31 = vpop.f32.mrf.mxu1 }
 0x444   :  { %v2175_v3 = vmul.f32 %v1938_v31, %v4900_v6 }
 0x445   :  { %2322 = vmatpush.msra.mxu1 %v4725_v20  ;;  %2466 = vmatpush.msrb.mxu0 %v4689_v62  ;;  %v2083_v24 = vpop.f32.mrf.mxu0 }
 0x446   :  { %3615 = vmatmul.msk.f32.vlgmr.msrb.gmra.mxu1 %vm94_vm1, %v4106_v55 }
 0x447   :  { %2404 = vmatpush.msrb.mxu1 %v4695_v23  ;;  %2467 = vmatpush.msrb.mxu0 %v4701_v11 }
 0x448   :  { %3622 = vmatmul.msk.f32.vlgmr.msra.gmra.mxu0 %vm58_vm0, %v4921_v25 }
 0x449   :  { %2405 = vmatpush.msrb.mxu1 %v4709_v17  ;;  %2548 = vmatpush.xpose.msra.mxu0 %v4673_v12 }
 0x44b   :  { %2406 = vmatpush.msrb.mxu1 %v4718_v9 }
 0x44d   :  { %2407 = vmatpush.msrb.mxu1 %v4725_v20  ;;  %2549 = vmatpush.xpose.msra.mxu0 %v4681_v39 }
 0x44e   :  { %3619 = vmatmul.msk.f32.vlgmr.msra.gmra.mxu1 %vm58_vm0, %v4921_v25 }
 0x44f   :  { %2488 = vmatpush.xpose.msra.mxu1 %v4695_v23 }
 0x450   :  { %3626 = vmatmul.msk.f32.vlgmr.msrb.gmra.mxu0 %vm58_vm0, %v4937_v8 }
 0x451   :  { %2550 = vmatpush.xpose.msra.mxu0 %v4689_v62 }
 0x453   :  { %v1741_v54 = vpop.f32.mrf.mxu2  ;;  %2489 = vmatpush.xpose.msra.mxu1 %v4709_v17 }
 0x454   :  { %v1742_v19 = vadd.f32 %v1741_v54, %v1721_v4  ;;  %v2190_v54 = vmul.f32 %v2083_v24, %v4895_v41 }
 0x455   :  { %2551 = vmatpush.xpose.msra.mxu0 %v4701_v11 }
 0x456   :  { %3623 = vmatmul.msk.f32.vlgmr.msrb.gmra.mxu1 %vm58_vm0, %v4937_v8 }
 0x457   :  { %2490 = vmatpush.xpose.msra.mxu1 %v4718_v9 }
 0x459   :  { %2682 = vmatpush.msrb.mxu0 %v4762_v47 }
 0x45b   :  { %2683 = vmatpush.msrb.mxu0 %v4769_v40  ;;  %v1873_v63 = vpop.f32.mrf.mxu2  ;;  %2491 = vmatpush.xpose.msra.mxu1 %v4725_v20 }
 0x45c   :  { %v1761_v48 = vpop.f32.mrf.mxu3  ;;  %v2087_v33 = vmul.f32 %v1873_v63, %v4834_v10 }
 0x45d   :  { %v1762_v28 = vadd.f32 %v1761_v48, %v1742_v19 }
 0x45e   :  { %2126 = vmatmul.f32.vlgmr.msrb.gmra.mxu2 %v2087_v33  ;;  %v2179_v33 = vsub.f32 1.0, %v2175_v3 }
 0x45f   :  { %2622 = vmatpush.msrb.mxu1 %v4780_v32  ;;  %v1782_v35 = vadd.f32 %v1781_v38, %v1762_v28  ;;  %2339 = vmatpush.msrb.mxu2 %v4583_v5  ;;  %v2023_v28 = vpop.f32.mrf.mxu1 }
 0x460   :  { %v2187_v41 = vmul.f32 %v2023_v28, %v4900_v6  ;;  %v2774_v28 = vrot.slane %v4026_v22, 5 }
 0x461   :  { %2623 = vmatpush.msrb.mxu1 %v4788_v43  ;;  %v1785_v44 = vrot.slane %v1782_v35, 1  ;;  %1787 = vst.msk [vmem:[#allocation2 + $0x3] sm:$0x1] %vm631_vm3, %v1782_v35  ;;  %2340 = vmatpush.msrb.mxu2 %v4596_v15 }
 0x463   :  { %1788 = vst.msk [vmem:[#allocation2 + $0xb] sm:$0x1] %vm631_vm3, %v1785_v44  ;;  %v1958_v34 = vpop.f32.mrf.mxu2  ;;  %2341 = vmatpush.msrb.mxu2 %v4615_v14 }
 0x464   :  { %v1893_v21 = vpop.f32.mrf.mxu3  ;;  %v2176_v51 = vmul.f32 %v1958_v34, %v1873_v63  ;;  %v2183_v34 = vmul.f32 %v2179_v33, %v4854_v60 }
 0x465   :  { %v2088_v30 = vmul.f32 %v1893_v21, %v4845_v50  ;;  %2342 = vmatpush.msrb.mxu2 %v4634_v26 }
 0x466   :  { %3616 = vmatmul.msk.f32.vlgmr.msra.gmra.mxu2 %vm94_vm1, %v4106_v55  ;;  %v2180_v29 = vsub.f32 1.0, %v2176_v51  ;;  %v5003_v6 = vadd.f32 %v2187_v41, %v2183_v34 }
 0x467   :  { %2146 = vmatmul.f32.vlgmr.msra.gmra.mxu3 %v2088_v30  ;;  %2424 = vmatpush.msra.mxu2 %v4583_v5 }
 0x468   :  { %2359 = vmatpush.msra.mxu3 %v4797_v46  ;;  %v2184_v19 = vmul.f32 %v2180_v29, %v4834_v10 }
 0x469   :  { %2425 = vmatpush.msra.mxu2 %v4596_v15 }
 0x46a   :  { %2360 = vmatpush.msra.mxu3 %v4804_v52 }
 0x46b   :  { %v2043_v4 = vpop.f32.mrf.mxu2  ;;  %2426 = vmatpush.msra.mxu2 %v4615_v14 }
 0x46c   :  { %v1978_v38 = vpop.f32.mrf.mxu3  ;;  %2361 = vmatpush.msra.mxu3 %v4812_v37  ;;  %v2188_v7 = vmul.f32 %v2043_v4, %v1873_v63  ;;  %v2186_v63 = vmul.f32 %v2182_v61, %v4838_v53 }
 0x46d   :  { %v2177_v1 = vmul.f32 %v1978_v38, %v1893_v21  ;;  %2427 = vmatpush.msra.mxu2 %v4634_v26 }
 0x46e   :  { %2362 = vmatpush.msra.mxu3 %v4819_v27  ;;  %3620 = vmatmul.msk.f32.vlgmr.msrb.gmra.mxu2 %vm58_vm0, %v4921_v25  ;;  %v4983_v35 = vadd.f32 %v2188_v7, %v2184_v19  ;;  %v4987_v44 = vadd.f32 %v2190_v54, %v2186_v63  ;;  %v2688_v7 = vrot.slane %v3981_v13, 6  ;;  %v2689_v54 = vrot.slane %v3926_v0, 5 }
 0x46f   :  { %3617 = vmatmul.msk.f32.vlgmr.msrb.gmra.mxu3 %vm94_vm1, %v4106_v55  ;;  %2508 = vmatpush.xpose.msrb.mxu2 %v4583_v5  ;;  %v2181_v48 = vsub.f32 1.0, %v2177_v1 }
 0x470   :  { %2444 = vmatpush.msrb.mxu3 %v4797_v46  ;;  %v2199_v53 = vrot.slane %v4983_v35, 7  ;;  %v5060_v19 = vsel %vm268_vm10, %v2689_v54, %v2688_v7 }
 0x471   :  { %v2185_v10 = vmul.f32 %v2181_v48, %v4845_v50  ;;  %v2201_v50 = vrot.slane %v4987_v44, 5  ;;  %v2773_v48 = vrot.slane %v4006_v18, 6 }
 0x472   :  { %2445 = vmatpush.msrb.mxu3 %v4804_v52  ;;  %v2205_v31 = vsel %vm268_vm10, %v5003_v6, %v2199_v53 }
 0x473   :  { %2509 = vmatpush.xpose.msrb.mxu2 %v4596_v15  ;;  %v5076_v63 = vsel %vm268_vm10, %v2774_v28, %v2773_v48 }
 0x474   :  { %v2063_v55 = vpop.f32.mrf.mxu3  ;;  %2446 = vmatpush.msrb.mxu3 %v4812_v37 }
 0x475   :  { %v2189_v42 = vmul.f32 %v2063_v55, %v1893_v21  ;;  %v2202_v21 = vsel %vm262_vm12, %v5003_v6, %v2199_v53 }
 0x476   :  { %2447 = vmatpush.msrb.mxu3 %v4819_v27  ;;  %3624 = vmatmul.msk.f32.vlgmr.msra.gmra.mxu2 %vm58_vm0, %v4937_v8 }
 0x477   :  { %v4994_v30 = vadd.f32 %v2189_v42, %v2185_v10  ;;  %3621 = vmatmul.msk.f32.vlgmr.msra.gmra.mxu3 %vm58_vm0, %v4921_v25  ;;  %2510 = vmatpush.xpose.msrb.mxu2 %v4615_v14 }
 0x478   :  { %2528 = vmatpush.xpose.msra.mxu3 %v4797_v46 }
 0x479   :  { %v2200_v60 = vrot.slane %v4994_v30, 6 }
 0x47b   :  { %v2203_v25 = vsel %vm264_vm13, %v2200_v60, %v2201_v50  ;;  %v2206_v51 = vsel %vm270_vm11, %v2200_v60, %v2201_v50  ;;  %2511 = vmatpush.xpose.msrb.mxu2 %v4634_v26 }
 0x47c   :  { %v2204_v36 = vsel %vm266_vm15, %v2202_v21, %v2203_v25  ;;  %v2207_v38 = vsel %vm272_vm14, %v2205_v31, %v2206_v51  ;;  %2529 = vmatpush.xpose.msra.mxu3 %v4804_v52 }
 0x47d   :  { %v2208_v4 = vrot.slane %v2207_v38, 1  ;;  %3613 = vst.msk [vmem:[%s5400_s15 + $0x5] ss:$8 sm:$0xf] %vm4244_vm2, %v2204_v36 }
 0x47f   :  { %2642 = vmatpush.msra.mxu2 %v4641_v16  ;;  %3625 = vmatmul.msk.f32.vlgmr.msrb.gmra.mxu3 %vm58_vm0, %v4937_v8  ;;  %3614 = vst.msk [vmem:[%s5400_s15 + $0x45] ss:$8 sm:$0xf] %vm4244_vm2, %v2208_v4 }
 0x480   :  { %2530 = vmatpush.xpose.msra.mxu3 %v4812_v37 }
 0x481   :  { %2643 = vmatpush.msra.mxu2 %v4654_v59 }
 0x484   :  { %2531 = vmatpush.xpose.msra.mxu3 %v4819_v27 }
 0x488   :  { %2662 = vmatpush.msrb.mxu3 %v4886_v58 }
 0x48a   :  { %2663 = vmatpush.msrb.mxu3 %v4892_v2 }
 0x4b5   :  { %v2167_v29 = vpop.f32.mrf.mxu0 }
 0x4bb   :  { %v2107_v1 = vpop.f32.mrf.mxu1 }
 0x4bd   :  { %v5034_v24 = vpop.f32.mrf.mxu0 }
 0x4be   :  { %v2475_v8 = vmul.f32 %v5034_v24, %v4987_v44 }
 0x4c0   :  { %2552 = vmatmul.f32.vlgmr.msra.gmra.mxu0 %v2475_v8 }
 0x4c1   :  { %2765 = vmatpush.msra.mxu0 %v4673_v12 }
 0x4c3   :  { %v5039_v61 = vpop.f32.mrf.mxu1  ;;  %2766 = vmatpush.msra.mxu0 %v4681_v39 }
 0x4c4   :  { %v2472_v3 = vmul.f32 %v5039_v61, %v5003_v6 }
 0x4c5   :  { %2767 = vmatpush.msra.mxu0 %v4689_v62 }
 0x4c6   :  { %2492 = vmatmul.f32.vlgmr.msra.gmra.mxu1 %v2472_v3 }
 0x4c7   :  { %2705 = vmatpush.msra.mxu1 %v4695_v23  ;;  %2768 = vmatpush.msra.mxu0 %v4701_v11 }
 0x4c8   :  { %3632 = vmatmul.msk.f32.vlgmr.msrb.gmra.mxu0 %vm94_vm1, %v4109_v56 }
 0x4c9   :  { %2706 = vmatpush.msra.mxu1 %v4709_v17  ;;  %2850 = vmatpush.msrb.mxu0 %v4673_v12 }
 0x4cb   :  { %2707 = vmatpush.msra.mxu1 %v4718_v9  ;;  %2851 = vmatpush.msrb.mxu0 %v4681_v39  ;;  %v2324_v60 = vpop.f32.mrf.mxu1 }
 0x4cd   :  { %2708 = vmatpush.msra.mxu1 %v4725_v20  ;;  %2852 = vmatpush.msrb.mxu0 %v4689_v62 }
 0x4ce   :  { %3629 = vmatmul.msk.f32.vlgmr.msrb.gmra.mxu1 %vm94_vm1, %v4109_v56 }
 0x4cf   :  { %2790 = vmatpush.msrb.mxu1 %v4695_v23  ;;  %2853 = vmatpush.msrb.mxu0 %v4701_v11 }
 0x4d0   :  { %3636 = vmatmul.msk.f32.vlgmr.msra.gmra.mxu0 %vm58_vm0, %v5060_v19 }
 0x4d1   :  { %2791 = vmatpush.msrb.mxu1 %v4709_v17  ;;  %2934 = vmatpush.xpose.msra.mxu0 %v4673_v12 }
 0x4d3   :  { %2792 = vmatpush.msrb.mxu1 %v4718_v9  ;;  %v2409_v48 = vpop.f32.mrf.mxu1 }
 0x4d5   :  { %2793 = vmatpush.msrb.mxu1 %v4725_v20  ;;  %2935 = vmatpush.xpose.msra.mxu0 %v4681_v39 }
 0x4d6   :  { %3633 = vmatmul.msk.f32.vlgmr.msra.gmra.mxu1 %vm58_vm0, %v5060_v19 }
 0x4d7   :  { %2874 = vmatpush.xpose.msra.mxu1 %v4695_v23 }
 0x4d8   :  { %3640 = vmatmul.msk.f32.vlgmr.msrb.gmra.mxu0 %vm58_vm0, %v5076_v63 }
 0x4d9   :  { %2936 = vmatpush.xpose.msra.mxu0 %v4689_v62 }
 0x4db   :  { %2875 = vmatpush.xpose.msra.mxu1 %v4709_v17 }
 0x4dd   :  { %2937 = vmatpush.xpose.msra.mxu0 %v4701_v11 }
 0x4de   :  { %3637 = vmatmul.msk.f32.vlgmr.msrb.gmra.mxu1 %vm58_vm0, %v5076_v63 }
 0x4df   :  { %2876 = vmatpush.xpose.msra.mxu1 %v4718_v9 }
 0x4e1   :  { %3068 = vmatpush.msrb.mxu0 %v4762_v47  ;;  %v2127_v33 = vpop.f32.mrf.mxu2 }
 0x4e2   :  { %v2128_v55 = vadd.f32 %v2127_v33, %v2107_v1  ;;  %v2561_v1 = vmul.f32 %v2324_v60, %v5039_v61 }
 0x4e3   :  { %3069 = vmatpush.msrb.mxu0 %v4769_v40  ;;  %2877 = vmatpush.xpose.msra.mxu1 %v4725_v20  ;;  %v2384_v40 = vpop.f32.mrf.mxu0 }
 0x4e4   :  { %v2564_v31 = vmul.f32 %v2384_v40, %v5034_v24  ;;  %v2565_v33 = vsub.f32 1.0, %v2561_v1 }
 0x4e7   :  { %3008 = vmatpush.msrb.mxu1 %v4780_v32 }
 0x4e9   :  { %3009 = vmatpush.msrb.mxu1 %v4788_v43  ;;  %v2259_v10 = vpop.f32.mrf.mxu2 }
 0x4ea   :  { %v2147_v41 = vpop.f32.mrf.mxu3  ;;  %v2473_v34 = vmul.f32 %v2259_v10, %v4983_v35 }
 0x4eb   :  { %v2148_v42 = vadd.f32 %v2147_v41, %v2128_v55  ;;  %v2469_v4 = vpop.f32.mrf.mxu0 }
 0x4ec   :  { %2512 = vmatmul.f32.vlgmr.msrb.gmra.mxu2 %v2473_v34  ;;  %v2576_v3 = vmul.f32 %v2469_v4, %v5034_v24  ;;  %v2573_v24 = vmul.f32 %v2409_v48, %v5039_v61 }
 0x4ed   :  { %v2168_v53 = vadd.f32 %v2167_v29, %v2148_v42  ;;  %2725 = vmatpush.msrb.mxu2 %v4583_v5  ;;  %v2568_v29 = vsub.f32 1.0, %v2564_v31  ;;  %v2569_v42 = vmul.f32 %v2565_v33, %v5003_v6 }
 0x4ef   :  { %v2171_v47 = vrot.slane %v2168_v53, 1  ;;  %2173 = vst.msk [vmem:[#allocation2 + $0x4] sm:$0x1] %vm631_vm3, %v2168_v53  ;;  %2726 = vmatpush.msrb.mxu2 %v4596_v15  ;;  %v2572_v28 = vmul.f32 %v2568_v29, %v4987_v44  ;;  %v5142_v61 = vadd.f32 %v2573_v24, %v2569_v42  ;;  %v3728_v29 = vld [vmem:[%s5390_s5 + $0x48] sm:$0xff] }
 0x4f1   :  { %2174 = vst.msk [vmem:[#allocation2 + $0xc] sm:$0x1] %vm631_vm3, %v2171_v47  ;;  %v2344_v43 = vpop.f32.mrf.mxu2  ;;  %2727 = vmatpush.msrb.mxu2 %v4615_v14  ;;  %v5126_v41 = vadd.f32 %v2576_v3, %v2572_v28 }
 0x4f2   :  { %v2279_v32 = vpop.f32.mrf.mxu3  ;;  %v2562_v21 = vmul.f32 %v2344_v43, %v2259_v10 }
 0x4f3   :  { %v2474_v50 = vmul.f32 %v2279_v32, %v4994_v30  ;;  %2728 = vmatpush.msrb.mxu2 %v4634_v26 }
 0x4f4   :  { %3630 = vmatmul.msk.f32.vlgmr.msra.gmra.mxu2 %vm94_vm1, %v4109_v56  ;;  %v2566_v36 = vsub.f32 1.0, %v2562_v21 }
 0x4f5   :  { %2532 = vmatmul.f32.vlgmr.msra.gmra.mxu3 %v2474_v50  ;;  %2810 = vmatpush.msra.mxu2 %v4583_v5 }
 0x4f6   :  { %2745 = vmatpush.msra.mxu3 %v4797_v46  ;;  %v2570_v7 = vmul.f32 %v2566_v36, %v4983_v35 }
 0x4f7   :  { %2811 = vmatpush.msra.mxu2 %v4596_v15 }
 0x4f8   :  { %2746 = vmatpush.msra.mxu3 %v4804_v52 }
 0x4f9   :  { %v2429_v51 = vpop.f32.mrf.mxu2  ;;  %2812 = vmatpush.msra.mxu2 %v4615_v14 }
 0x4fa   :  { %v2364_v25 = vpop.f32.mrf.mxu3  ;;  %2747 = vmatpush.msra.mxu3 %v4812_v37  ;;  %v2574_v8 = vmul.f32 %v2429_v51, %v2259_v10 }
 0x4fb   :  { %v2563_v38 = vmul.f32 %v2364_v25, %v2279_v32  ;;  %2813 = vmatpush.msra.mxu2 %v4634_v26 }
 0x4fc   :  { %2748 = vmatpush.msra.mxu3 %v4819_v27  ;;  %3634 = vmatmul.msk.f32.vlgmr.msrb.gmra.mxu2 %vm58_vm0, %v5060_v19  ;;  %v5122_v55 = vadd.f32 %v2574_v8, %v2570_v7 }
 0x4fd   :  { %3631 = vmatmul.msk.f32.vlgmr.msrb.gmra.mxu3 %vm94_vm1, %v4109_v56  ;;  %2894 = vmatpush.xpose.msrb.mxu2 %v4583_v5  ;;  %v2567_v54 = vsub.f32 1.0, %v2563_v38 }
 0x4fe   :  { %2830 = vmatpush.msrb.mxu3 %v4797_v46  ;;  %v2585_v44 = vrot.slane %v5122_v55, 7 }
 0x4ff   :  { %v2571_v35 = vmul.f32 %v2567_v54, %v4994_v30  ;;  %v2587_v30 = vrot.slane %v5126_v41, 5 }
 0x500   :  { %2831 = vmatpush.msrb.mxu3 %v4804_v52  ;;  %v2588_v53 = vsel %vm262_vm12, %v5142_v61, %v2585_v44  ;;  %v2591_v47 = vsel %vm268_vm10, %v5142_v61, %v2585_v44 }
 0x501   :  { %2895 = vmatpush.xpose.msrb.mxu2 %v4596_v15 }
 0x502   :  { %v2449_v56 = vpop.f32.mrf.mxu3  ;;  %2832 = vmatpush.msrb.mxu3 %v4812_v37 }
 0x503   :  { %v2575_v10 = vmul.f32 %v2449_v56, %v2279_v32 }
 0x504   :  { %2833 = vmatpush.msrb.mxu3 %v4819_v27  ;;  %3638 = vmatmul.msk.f32.vlgmr.msra.gmra.mxu2 %vm58_vm0, %v5076_v63 }
 0x505   :  { %v5133_v34 = vadd.f32 %v2575_v10, %v2571_v35  ;;  %3635 = vmatmul.msk.f32.vlgmr.msra.gmra.mxu3 %vm58_vm0, %v5060_v19  ;;  %2896 = vmatpush.xpose.msrb.mxu2 %v4615_v14 }
 0x506   :  { %2914 = vmatpush.xpose.msra.mxu3 %v4797_v46 }
 0x507   :  { %v2586_v6 = vrot.slane %v5133_v34, 6 }
 0x509   :  { %v2589_v19 = vsel %vm264_vm13, %v2586_v6, %v2587_v30  ;;  %v2592_v40 = vsel %vm270_vm11, %v2586_v6, %v2587_v30  ;;  %2897 = vmatpush.xpose.msrb.mxu2 %v4634_v26 }
 0x50a   :  { %v2590_v32 = vsel %vm266_vm15, %v2588_v53, %v2589_v19  ;;  %v2593_v43 = vsel %vm272_vm14, %v2591_v47, %v2592_v40  ;;  %2915 = vmatpush.xpose.msra.mxu3 %v4804_v52  ;;  %v3729_v40 = vld [vmem:[%s5390_s5 + $0x28] sm:$0xff] }
 0x50b   :  { %v2594_v50 = vrot.slane %v2593_v43, 1  ;;  %3627 = vst.msk [vmem:[%s5400_s15 + $0x6] ss:$8 sm:$0xf] %vm4244_vm2, %v2590_v32 }
 0x50d   :  { %3028 = vmatpush.msra.mxu2 %v4641_v16  ;;  %3639 = vmatmul.msk.f32.vlgmr.msrb.gmra.mxu3 %vm58_vm0, %v5076_v63  ;;  %3628 = vst.msk [vmem:[%s5400_s15 + $0x46] ss:$8 sm:$0xf] %vm4244_vm2, %v2594_v50 }
 0x50e   :  { %2916 = vmatpush.xpose.msra.mxu3 %v4812_v37 }
 0x50f   :  { %3029 = vmatpush.msra.mxu2 %v4654_v59 }
 0x512   :  { %2917 = vmatpush.xpose.msra.mxu3 %v4819_v27 }
 0x516   :  { %3048 = vmatpush.msrb.mxu3 %v4886_v58  ;;  %v3074_v58 = vrot.slane %v3981_v13, 7  ;;  %v3160_v13 = vrot.slane %v4026_v22, 6 }
 0x518   :  { %3049 = vmatpush.msrb.mxu3 %v4892_v2  ;;  %v3075_v2 = vrot.slane %v3926_v0, 6  ;;  %v3159_v0 = vrot.slane %v4006_v18, 7 }
 0x51a   :  { %v5199_v25 = vsel %vm268_vm10, %v3075_v2, %v3074_v58  ;;  %v5215_v51 = vsel %vm268_vm10, %v3160_v13, %v3159_v0 }
 0x53d   :  { %v2553_v16 = vpop.f32.mrf.mxu0 }
 0x543   :  { %v2493_v60 = vpop.f32.mrf.mxu1 }
 0x545   :  { %v5173_v21 = vpop.f32.mrf.mxu0 }
 0x546   :  { %v2861_v59 = vmul.f32 %v5173_v21, %v5126_v41 }
 0x548   :  { %2938 = vmatmul.f32.vlgmr.msra.gmra.mxu0 %v2861_v59  ;;  %v3730_v59 = vld [vmem:[%s5390_s5 + $0x8] sm:$0xff] }
 0x549   :  { %3151 = vmatpush.msra.mxu0 %v4673_v12 }
 0x54b   :  { %v5178_v63 = vpop.f32.mrf.mxu1  ;;  %3152 = vmatpush.msra.mxu0 %v4681_v39 }
 0x54c   :  { %v2858_v31 = vmul.f32 %v5178_v63, %v5142_v61 }
 0x54d   :  { %3153 = vmatpush.msra.mxu0 %v4689_v62 }
 0x54e   :  { %2878 = vmatmul.f32.vlgmr.msra.gmra.mxu1 %v2858_v31 }
 0x54f   :  { %3091 = vmatpush.msra.mxu1 %v4695_v23  ;;  %3154 = vmatpush.msra.mxu0 %v4701_v11 }
 0x550   :  { %3646 = vmatmul.msk.f32.vlgmr.msrb.gmra.mxu0 %vm94_vm1, %v4112_v57 }
 0x551   :  { %3092 = vmatpush.msra.mxu1 %v4709_v17  ;;  %3236 = vmatpush.msrb.mxu0 %v4673_v12 }
 0x553   :  { %3093 = vmatpush.msra.mxu1 %v4718_v9  ;;  %3237 = vmatpush.msrb.mxu0 %v4681_v39 }
 0x555   :  { %3094 = vmatpush.msra.mxu1 %v4725_v20  ;;  %3238 = vmatpush.msrb.mxu0 %v4689_v62 }
 0x556   :  { %3643 = vmatmul.msk.f32.vlgmr.msrb.gmra.mxu1 %vm94_vm1, %v4112_v57 }
 0x557   :  { %3176 = vmatpush.msrb.mxu1 %v4695_v23  ;;  %3239 = vmatpush.msrb.mxu0 %v4701_v11 }
 0x558   :  { %3650 = vmatmul.msk.f32.vlgmr.msra.gmra.mxu0 %vm58_vm0, %v5199_v25 }
 0x559   :  { %3177 = vmatpush.msrb.mxu1 %v4709_v17  ;;  %3320 = vmatpush.xpose.msra.mxu0 %v4673_v12 }
 0x55b   :  { %3178 = vmatpush.msrb.mxu1 %v4718_v9 }
 0x55d   :  { %3179 = vmatpush.msrb.mxu1 %v4725_v20  ;;  %3321 = vmatpush.xpose.msra.mxu0 %v4681_v39 }
 0x55e   :  { %3647 = vmatmul.msk.f32.vlgmr.msra.gmra.mxu1 %vm58_vm0, %v5199_v25 }
 0x55f   :  { %3260 = vmatpush.xpose.msra.mxu1 %v4695_v23 }
 0x560   :  { %3654 = vmatmul.msk.f32.vlgmr.msrb.gmra.mxu0 %vm58_vm0, %v5215_v51 }
 0x561   :  { %3322 = vmatpush.xpose.msra.mxu0 %v4689_v62 }
 0x563   :  { %3261 = vmatpush.xpose.msra.mxu1 %v4709_v17 }
 0x565   :  { %3323 = vmatpush.xpose.msra.mxu0 %v4701_v11  ;;  %v2770_v11 = vpop.f32.mrf.mxu0 }
 0x566   :  { %3651 = vmatmul.msk.f32.vlgmr.msrb.gmra.mxu1 %vm58_vm0, %v5215_v51  ;;  %v2950_v1 = vmul.f32 %v2770_v11, %v5173_v21 }
 0x567   :  { %3262 = vmatpush.xpose.msra.mxu1 %v4718_v9 }
 0x568   :  { %v2954_v28 = vsub.f32 1.0, %v2950_v1 }
 0x56b   :  { %3263 = vmatpush.xpose.msra.mxu1 %v4725_v20 }
 0x56d   :  { %v2855_v48 = vpop.f32.mrf.mxu0 }
 0x56f   :  { %v2513_v18 = vpop.f32.mrf.mxu2 }
 0x570   :  { %v2514_v22 = vadd.f32 %v2513_v18, %v2493_v60 }
 0x577   :  { %v2645_v39 = vpop.f32.mrf.mxu2 }
 0x578   :  { %v2533_v12 = vpop.f32.mrf.mxu3  ;;  %v2859_v36 = vmul.f32 %v2645_v39, %v5122_v55 }
 0x579   :  { %v2534_v23 = vadd.f32 %v2533_v12, %v2514_v22 }
 0x57a   :  { %2898 = vmatmul.f32.vlgmr.msrb.gmra.mxu2 %v2859_v36 }
 0x57b   :  { %v2554_v38 = vadd.f32 %v2553_v16, %v2534_v23  ;;  %3111 = vmatpush.msrb.mxu2 %v4583_v5  ;;  %v2710_v5 = vpop.f32.mrf.mxu1 }
 0x57c   :  { %v2947_v33 = vmul.f32 %v2710_v5, %v5178_v63 }
 0x57d   :  { %v2557_v62 = vrot.slane %v2554_v38, 1  ;;  %2559 = vst.msk [vmem:[#allocation2 + $0x5] sm:$0x1] %vm631_vm3, %v2554_v38  ;;  %3112 = vmatpush.msrb.mxu2 %v4596_v15  ;;  %v3727_v15 = vld [vmem:[%s5390_s5 + $0x68] sm:$0xff] }
 0x57e   :  { %v2951_v42 = vsub.f32 1.0, %v2947_v33 }
 0x57f   :  { %2560 = vst.msk [vmem:[#allocation2 + $0xd] sm:$0x1] %vm631_vm3, %v2557_v62  ;;  %v2730_v9 = vpop.f32.mrf.mxu2  ;;  %3113 = vmatpush.msrb.mxu2 %v4615_v14 }
 0x580   :  { %v2665_v17 = vpop.f32.mrf.mxu3  ;;  %v2948_v4 = vmul.f32 %v2730_v9, %v2645_v39  ;;  %v2955_v47 = vmul.f32 %v2951_v42, %v5142_v61 }
 0x581   :  { %v2860_v20 = vmul.f32 %v2665_v17, %v5133_v34  ;;  %3114 = vmatpush.msrb.mxu2 %v4634_v26 }
 0x582   :  { %3644 = vmatmul.msk.f32.vlgmr.msra.gmra.mxu2 %vm94_vm1, %v4112_v57  ;;  %v2952_v7 = vsub.f32 1.0, %v2948_v4 }
 0x583   :  { %2918 = vmatmul.f32.vlgmr.msra.gmra.mxu3 %v2860_v20  ;;  %3196 = vmatpush.msra.mxu2 %v3727_v15  ;;  %v2795_v10 = vpop.f32.mrf.mxu1 }
 0x584   :  { %3131 = vmatpush.msra.mxu3 %v4797_v46  ;;  %v2956_v24 = vmul.f32 %v2952_v7, %v5122_v55  ;;  %v2959_v6 = vmul.f32 %v2795_v10, %v5178_v63 }
 0x585   :  { %3197 = vmatpush.msra.mxu2 %v3728_v29 }
 0x586   :  { %3132 = vmatpush.msra.mxu3 %v4804_v52  ;;  %v5281_v61 = vadd.f32 %v2959_v6, %v2955_v47 }
 0x587   :  { %v2815_v3 = vpop.f32.mrf.mxu2  ;;  %3198 = vmatpush.msra.mxu2 %v4615_v14  ;;  %v2962_v14 = vmul.f32 %v2855_v48, %v5173_v21 }
 0x588   :  { %v2750_v8 = vpop.f32.mrf.mxu3  ;;  %3133 = vmatpush.msra.mxu3 %v4812_v37  ;;  %v2960_v56 = vmul.f32 %v2815_v3, %v2645_v39 }
 0x589   :  { %v2949_v54 = vmul.f32 %v2750_v8, %v2665_v17  ;;  %3199 = vmatpush.msra.mxu2 %v4634_v26  ;;  %v2958_v26 = vmul.f32 %v2954_v28, %v5126_v41 }
 0x58a   :  { %3134 = vmatpush.msra.mxu3 %v4819_v27  ;;  %3648 = vmatmul.msk.f32.vlgmr.msrb.gmra.mxu2 %vm58_vm0, %v5199_v25  ;;  %v5260_v44 = vadd.f32 %v2960_v56, %v2956_v24 }
 0x58b   :  { %3645 = vmatmul.msk.f32.vlgmr.msrb.gmra.mxu3 %vm94_vm1, %v4112_v57  ;;  %3280 = vmatpush.xpose.msrb.mxu2 %v3727_v15  ;;  %v2953_v35 = vsub.f32 1.0, %v2949_v54  ;;  %v5263_v30 = vadd.f32 %v2962_v14, %v2958_v26 }
 0x58c   :  { %3216 = vmatpush.msrb.mxu3 %v4797_v46  ;;  %v2971_v41 = vrot.slane %v5260_v44, 7 }
 0x58d   :  { %v2957_v53 = vmul.f32 %v2953_v35, %v5133_v34  ;;  %v2973_v34 = vrot.slane %v5263_v30, 5 }
 0x58e   :  { %3217 = vmatpush.msrb.mxu3 %v4804_v52  ;;  %v2974_v43 = vsel %vm262_vm12, %v5281_v61, %v2971_v41  ;;  %v2977_v50 = vsel %vm268_vm10, %v5281_v61, %v2971_v41 }
 0x58f   :  { %3281 = vmatpush.xpose.msrb.mxu2 %v3728_v29 }
 0x590   :  { %v2835_v57 = vpop.f32.mrf.mxu3  ;;  %3218 = vmatpush.msrb.mxu3 %v4812_v37 }
 0x591   :  { %v2961_v55 = vmul.f32 %v2835_v57, %v2665_v17 }
 0x592   :  { %3219 = vmatpush.msrb.mxu3 %v4819_v27  ;;  %3652 = vmatmul.msk.f32.vlgmr.msra.gmra.mxu2 %vm58_vm0, %v5215_v51 }
 0x593   :  { %v5270_v19 = vadd.f32 %v2961_v55, %v2957_v53  ;;  %3649 = vmatmul.msk.f32.vlgmr.msra.gmra.mxu3 %vm58_vm0, %v5199_v25  ;;  %3282 = vmatpush.xpose.msrb.mxu2 %v3729_v40 }
 0x594   :  { %3300 = vmatpush.xpose.msra.mxu3 %v4797_v46 }
 0x595   :  { %v2972_v32 = vrot.slane %v5270_v19, 6 }
 0x597   :  { %v2975_v16 = vsel %vm264_vm13, %v2972_v32, %v2973_v34  ;;  %v2978_v60 = vsel %vm270_vm11, %v2972_v32, %v2973_v34  ;;  %3283 = vmatpush.xpose.msrb.mxu2 %v3730_v59  ;;  %v3379_v59 = vld [vmem:[%s5395_s10 + $0x20] sm:$0xff] }
 0x598   :  { %v2976_v21 = vsel %vm266_vm15, %v2974_v43, %v2975_v16  ;;  %v2979_v46 = vsel %vm272_vm14, %v2977_v50, %v2978_v60  ;;  %3301 = vmatpush.xpose.msra.mxu3 %v4804_v52  ;;  %v3377_v50 = vld [vmem:[%s5395_s10 + $0x10] sm:$0xff]  ;;  %v3382_v16 = vld [vmem:[%s5395_s10 + $0x38] sm:$0xff] }
 0x599   :  { %v2980_v63 = vrot.slane %v2979_v46, 1  ;;  %3641 = vst.msk [vmem:[%s5400_s15 + $0x7] ss:$8 sm:$0xf] %vm4244_vm2, %v2976_v21  ;;  %3397 = vmatpush.msrb.mxu1 %v3382_v16  ;;  %v3381_v60 = vld [vmem:[%s5395_s10 + $0x30] sm:$0xff]  ;;  %v3375_v21 = vld [vmem:[%s5395_s10] sm:$0xff] }
 0x59a   :  { %v3380_v46 = vld [vmem:[%s5395_s10 + $0x28] sm:$0xff]  ;;  %v3507_v16 = vand.u32 127, %v277_v45 }
 0x59b   :  { %3653 = vmatmul.msk.f32.vlgmr.msrb.gmra.mxu3 %vm58_vm0, %v5215_v51  ;;  %3642 = vst.msk [vmem:[%s5400_s15 + $0x47] ss:$8 sm:$0xf] %vm4244_vm2, %v2980_v63  ;;  %3398 = vmatpush.msrb.mxu1 %v3381_v60  ;;  %v3731_v63 = vld [vmem:[%s5385_s0] sm:$0xff] }
 0x59c   :  { %3302 = vmatpush.xpose.msra.mxu3 %v4812_v37 }
 0x59d   :  { %3399 = vmatpush.msrb.mxu1 %v3380_v46 }
 0x59f   :  { %3400 = vmatpush.msrb.mxu1 %v3379_v59 }
 0x5a0   :  { %3303 = vmatpush.xpose.msra.mxu3 %v4819_v27 }
 0x5c5   :  { %v2939_v52 = vpop.f32.mrf.mxu0 }
 0x5cb   :  { %v2879_v31 = vpop.f32.mrf.mxu1 }
 0x5cd   :  { %v3071_v58 = vpop.f32.mrf.mxu0 }
 0x5ce   :  { %v3247_v2 = vmul.f32 %v3071_v58, %v5263_v30 }
 0x5d0   :  { %3324 = vmatmul.f32.vlgmr.msra.gmra.mxu0 %v3247_v2 }
 0x5d3   :  { %v3011_v25 = vpop.f32.mrf.mxu1 }
 0x5d4   :  { %v3244_v0 = vmul.f32 %v3011_v25, %v5281_v61 }
 0x5d5   :  { %v3156_v23 = vpop.f32.mrf.mxu0 }
 0x5d6   :  { %3264 = vmatmul.f32.vlgmr.msra.gmra.mxu1 %v3244_v0  ;;  %v3336_v9 = vmul.f32 %v3156_v23, %v3071_v58  ;;  %v3668_v23 = vld [vmem:[%s5396_s11] ss:$0 sm:$0xff]  ;;  %s3760_s11 = smov [#allocation4]  }
 0x5d8   :  { %v3340_v1 = vsub.f32 1.0, %v3336_v9  ;;  %v3669_v9 = vld [vmem:[%s5397_s12] ss:$0 sm:$0xff]  ;;  %s3519_s12 = sshll.u32 %s3760_s11, 4  ;;  %s3520_s12 = int_to_ptr.vmem [resolvable:$true] %s3519_s12 }
 0x5da   :  { %v3344_v33 = vmul.f32 %v3340_v1, %v5263_v30 }
 0x5db   :  { %v3096_v11 = vpop.f32.mrf.mxu1 }
 0x5dc   :  { %v3333_v8 = vmul.f32 %v3096_v11, %v3011_v25 }
 0x5dd   :  { %v3241_v29 = vpop.f32.mrf.mxu0 }
 0x5de   :  { %v3348_v7 = vmul.f32 %v3241_v29, %v3071_v58  ;;  %v3337_v56 = vsub.f32 1.0, %v3333_v8  ;;  %3657 = vmatmul.msk.f32.vlgmr.msrb.gmra.mxu1 %vm58_vm0, %v3731_v63 }
 0x5e0   :  { %v3352_v35 = vadd.f32 %v3348_v7, %v3344_v33  ;;  %v3341_v57 = vmul.f32 %v3337_v56, %v5281_v61  ;;  %v3378_v61 = vld [vmem:[%s5395_s10 + $0x18] sm:$0xff] }
 0x5e1   :  { %3426 = vmatpush.msra.mxu2 %v3378_v61 }
 0x5e2   :  { %v3359_v55 = vrot.slane %v3352_v35, 5 }
 0x5e3   :  { %v3181_v28 = vpop.f32.mrf.mxu1  ;;  %3427 = vmatpush.msra.mxu2 %v3377_v50 }
 0x5e4   :  { %v3345_v10 = vmul.f32 %v3181_v28, %v3011_v25 }
 0x5e5   :  { %3428 = vmatpush.msra.mxu2 %v3376_v49 }
 0x5e6   :  { %v3349_v47 = vadd.f32 %v3345_v10, %v3341_v57 }
 0x5e7   :  { %3429 = vmatpush.msra.mxu2 %v3375_v21 }
 0x5fd   :  { %v2899_v13 = vpop.f32.mrf.mxu2 }
 0x5fe   :  { %v2900_v51 = vadd.f32 %v2899_v13, %v2879_v31 }
 0x605   :  { %v3031_v22 = vpop.f32.mrf.mxu2 }
 0x606   :  { %v2919_v18 = vpop.f32.mrf.mxu3  ;;  %v3245_v39 = vmul.f32 %v3031_v22, %v5260_v44 }
 0x607   :  { %v2920_v12 = vadd.f32 %v2919_v18, %v2900_v51 }
 0x608   :  { %3284 = vmatmul.f32.vlgmr.msrb.gmra.mxu2 %v3245_v39  ;;  %v3759_v39 = vmov 0  }
 0x609   :  { %v2940_v37 = vadd.f32 %v2939_v52, %v2920_v12  ;;  %v3732_v52 = vld [vmem:[%s5385_s0 + $0x8] sm:$0xff]  ;;  %3665 = vset.pattern.permute.xlu0 %v3759_v39 }
 0x60a   :  { %3658 = vmatmul.msk.f32.gmra.mxu1 %vm58_vm0, %v3732_v52 }
 0x60b   :  { %v2943_v27 = vrot.slane %v2940_v37, 1  ;;  %2945 = vst.msk [vmem:[#allocation2 + $0x6] sm:$0x1] %vm631_vm3, %v2940_v37  ;;  %v3670_v37 = vld [vmem:[#allocation3] ss:$0 sm:$0xff] }
 0x60c   :  { %3461 = vperm.xlu0 %3665, %v3670_v37  }
 0x60d   :  { %2946 = vst.msk [vmem:[#allocation2 + $0xe] sm:$0x1] %vm631_vm3, %v2943_v27  ;;  %v3116_v38 = vpop.f32.mrf.mxu2 }
 0x60e   :  { %v3051_v36 = vpop.f32.mrf.mxu3  ;;  %v3334_v17 = vmul.f32 %v3116_v38, %v3031_v22 }
 0x60f   :  { %v3246_v62 = vmul.f32 %v3051_v36, %v5270_v19 }
 0x610   :  { %v3338_v15 = vsub.f32 1.0, %v3334_v17 }
 0x611   :  { %3304 = vmatmul.f32.vlgmr.msra.gmra.mxu3 %v3246_v62 }
 0x612   :  { %v3342_v54 = vmul.f32 %v3338_v15, %v5260_v44 }
 0x615   :  { %v3201_v5 = vpop.f32.mrf.mxu2 }
 0x616   :  { %v3136_v20 = vpop.f32.mrf.mxu3  ;;  %v3346_v3 = vmul.f32 %v3201_v5, %v3031_v22 }
 0x617   :  { %v3335_v4 = vmul.f32 %v3136_v20, %v3051_v36 }
 0x618   :  { %v3350_v14 = vadd.f32 %v3346_v3, %v3342_v54 }
 0x619   :  { %v3339_v48 = vsub.f32 1.0, %v3335_v4 }
 0x61a   :  { %v3357_v6 = vrot.slane %v3350_v14, 7 }
 0x61b   :  { %v3343_v26 = vmul.f32 %v3339_v48, %v5270_v19 }
 0x61c   :  { %v3360_v44 = vsel %vm262_vm12, %v3349_v47, %v3357_v6  ;;  %v3363_v40 = vsel %vm268_vm10, %v3349_v47, %v3357_v6 }
 0x61e   :  { %v3221_v24 = vpop.f32.mrf.mxu3 }
 0x61f   :  { %v3347_v42 = vmul.f32 %v3221_v24, %v3051_v36 }
 0x621   :  { %v3351_v53 = vadd.f32 %v3347_v42, %v3343_v26 }
 0x623   :  { %v3358_v41 = vrot.slane %v3351_v53, 6 }
 0x625   :  { %v3361_v30 = vsel %vm264_vm13, %v3358_v41, %v3359_v55  ;;  %v3364_v34 = vsel %vm270_vm11, %v3358_v41, %v3359_v55  ;;  %vm3512_vm11 = vcmask 58368  }
 0x626   :  { %v3362_v32 = vsel %vm266_vm15, %v3360_v44, %v3361_v30  ;;  %v3365_v19 = vsel %vm272_vm14, %v3363_v40, %v3364_v34 }
 0x627   :  { %v3366_v43 = vrot.slane %v3365_v19, 1  ;;  %3655 = vst.msk [vmem:[%s5400_s15 + $0x20] ss:$8 sm:$0xf] %vm4244_vm2, %v3362_v32 }
 0x629   :  { %3656 = vst.msk [vmem:[%s5400_s15 + $0x60] ss:$8 sm:$0xf] %vm4244_vm2, %v3366_v43 }
 0x64d   :  { %v3325_v13 = vpop.f32.mrf.mxu0 }
 0x653   :  { %v3265_v58 = vpop.f32.mrf.mxu1 }
 0x65b   :  { %v3402_v27 = vpop.f32.mrf.mxu1 }
 0x67e   :  { %v3462_v7 = vpop.permute.xlu0 %3461 }
 0x687   :  { %v3405_v11 = vpop.f32.mrf.mxu1 }
 0x68b   :  { %v3285_v31 = vpop.f32.mrf.mxu2 }
 0x68c   :  { %v3286_v2 = vadd.f32 %v3285_v31, %v3265_v58 }
 0x694   :  { %v3305_v25 = vpop.f32.mrf.mxu3 }
 0x695   :  { %v3306_v0 = vadd.f32 %v3305_v25, %v3286_v2 }
 0x697   :  { %v3326_v51 = vadd.f32 %v3325_v13, %v3306_v0 }
 0x699   :  { %v3329_v18 = vrot.slane %v3326_v51, 1  ;;  %3331 = vst.msk [vmem:[#allocation2 + $0x7] sm:$0x1] %vm631_vm3, %v3326_v51 }
 0x69b   :  { %3332 = vst.msk [vmem:[#allocation2 + $0xf] sm:$0x1] %vm631_vm3, %v3329_v18 }
 0x6a0   :  { %v3383_v22 = vld [vmem:[#allocation2] sm:$0xff] }
 0x6a1   :  { %3659 = vmatmul.msk.f32.vlgmr.msra.gmra.mxu2 %vm58_vm0, %v3383_v22 }
 0x6a2   :  { %v3384_v12 = vld [vmem:[#allocation2 + $0x8] sm:$0xff] }
 0x6a9   :  { %3660 = vmatmul.msk.f32.gmra.mxu2 %vm58_vm0, %v3384_v12 }
 0x724   :  { %v3431_v36 = vpop.f32.mrf.mxu2 }
 0x725   :  { %v3432_v38 = vadd.f32 %v3431_v36, %v3402_v27 }
 0x727   :  { %v3441_v62 = vadd.f32 %v3668_v23, %v3432_v38 }
 0x729   :  { %3691 = vtanh.f32 %v3441_v62 }
 0x72c   :  { %v3434_v17 = vpop.f32.mrf.mxu2 }
 0x72d   :  { %v3435_v20 = vadd.f32 %v3434_v17, %v3405_v11 }
 0x72f   :  { %v3692_v5 = vpop.eup %3691  ;;  %v3442_v15 = vadd.f32 %v3668_v23, %v3435_v20 }
 0x730   :  { %v3449_v4 = vmul.f32 %v3692_v5, %v3669_v9 }
 0x731   :  { %3693 = vtanh.f32 %v3442_v15 }
 0x732   :  { %v3451_v29 = vsel %vm58_vm0, %v3449_v4, 0.0 }
 0x733   :  { %3452 = vadd.xlane.f32.xlu2 %v3451_v29 }
 0x737   :  { %v3694_v1 = vpop.eup %3693 }
 0x738   :  { %v3450_v8 = vmul.f32 %v3694_v1, %v3669_v9 }
 0x73a   :  { %v3454_v3 = vsel %vm58_vm0, %v3450_v8, 0.0 }
 0x73b   :  { %3455 = vadd.xlane.f32.xlu2 %v3454_v3 }
 0x7a6   :  { %v3453_v54 = vpop.xlane.xlu2 %3452 }
 0x7a7   :  { %v3464_v48 = vadd.f32 %v3462_v7, %v3453_v54 }
 0x7a9   :  { %v3661_v28 = vmul.f32 -1.442695, %v3464_v48 }
 0x7ab   :  { %3695 = vpow2.f32 %v3661_v28 }
 0x7ae   :  { %v3456_v33 = vpop.xlane.xlu2 %3455 }
 0x7af   :  { %v3465_v56 = vadd.f32 %v3462_v7, %v3456_v33 }
 0x7b1   :  { %v3696_v14 = vpop.eup %3695  ;;  %v3662_v24 = vmul.f32 -1.442695, %v3465_v56 }
 0x7b2   :  { %v3472_v35 = vadd.f32 1.0, %v3696_v14 }
 0x7b3   :  { %3697 = vpow2.f32 %v3662_v24 }
 0x7b4   :  { %3699 = vrcp.f32 %v3472_v35  ;;  %v3485_v44 = vand.u32 2147483648, %v3472_v35  ;;  %vm3479_vm1 = vweird.f32 %v3472_v35  ;;  %v3483_v30 = vand.u32 2147483647, %v3472_v35 }
 0x7b6   :  { %v3486_v61 = vor.u32 1.1754944e-38, %v3485_v44  ;;  %vm3484_vm6 = vcmp.eq.f32.partialorder %v3483_v30, 8.507059e+37 }
 0x7b9   :  { %v3698_v10 = vpop.eup %3697 }
 0x7ba   :  { %v3700_v26 = vpop.eup %3699  ;;  %v3473_v42 = vadd.f32 1.0, %v3698_v10 }
 0x7bb   :  { %v3475_v57 = vmul.f32 %v3700_v26, %v3472_v35  ;;  %vm3480_vm0 = vweird.f32 %v3700_v26 }
 0x7bc   :  { %3701 = vrcp.f32 %v3473_v42  ;;  %vm3481_vm4 = vmor %vm3479_vm1, %vm3480_vm0  ;;  %v3500_v34 = vand.u32 2147483648, %v3473_v42  ;;  %v3498_v43 = vand.u32 2147483647, %v3473_v42  ;;  %vm3494_vm7 = vweird.f32 %v3473_v42 }
 0x7bd   :  { %v3476_v6 = vsub.f32 1.0, %v3475_v57 }
 0x7be   :  { %v3501_v60 = vor.u32 1.1754944e-38, %v3500_v34  ;;  %vm3499_vm9 = vcmp.eq.f32.partialorder %v3498_v43, 8.507059e+37 }
 0x7bf   :  { %v3477_v53 = vmul.f32 %v3700_v26, %v3476_v6 }
 0x7c1   :  { %v3478_v41 = vadd.f32 %v3700_v26, %v3477_v53 }
 0x7c2   :  { %v3702_v55 = vpop.eup %3701 }
 0x7c3   :  { %v3490_v47 = vmul.f32 %v3702_v55, %v3473_v42  ;;  %v3482_v19 = vsel %vm3481_vm4, %v3700_v26, %v3478_v41  ;;  %vm3495_vm5 = vweird.f32 %v3702_v55 }
 0x7c4   :  { %v3487_v49 = vsel %vm3484_vm6, %v3486_v61, %v3482_v19  ;;  %vm3496_vm8 = vmor %vm3494_vm7, %vm3495_vm5 }
 0x7c5   :  { %v3491_v40 = vsub.f32 1.0, %v3490_v47  ;;  %v3508_v59 = vperm.slane %v3487_v49, %v3507_v16 }
 0x7c7   :  { %v3492_v32 = vmul.f32 %v3702_v55, %v3491_v40 }
 0x7c9   :  { %v3493_v50 = vadd.f32 %v3702_v55, %v3492_v32 }
 0x7cb   :  { %v3497_v21 = vsel %vm3496_vm8, %v3702_v55, %v3493_v50 }
 0x7cc   :  { %v3502_v46 = vsel %vm3499_vm9, %v3501_v60, %v3497_v21 }
 0x7cd   :  { %v3509_v63 = vperm.slane %v3502_v46, %v3507_v16 }
 0x7cf   :  { %v3510_v52 = vsel %vm268_vm10, %v3509_v63, %v3508_v59 }
 0x7d0   :  { %3513 = vst.msk [vmem:[#allocation4] sm:$0x3] %vm3512_vm11, %v3510_v52 }
 0x7d1   :  { %3524 = dma.vmem_to_hbm [thread:$0]  %s3520_s12, 32, %s3522_s9, [#allocation5]  }
 0x7d2   :  { %3757 = dma.done.wait [#allocation5], 32  }
 0x7d3   :  { %3758 = vsyncadd [#allocation5], 4294967264 }
 0x7d4   :  { %3533 = vsyncpa [#allocation5], 1 }

</bundles_post_ra>
